<compile_context>
chip_gen: v5e
topology: v5e:2x2
jax: 0.10.0
libtpu: 0.0.40
codegen_flags: <defaults>
</compile_context>

<pallas_src>
import functools
import math

import jax
import jax.numpy as jnp
from jax.experimental import pallas as pl
from jax.experimental.pallas import tpu as pltpu


def _round_up(x, m):
    return ((x + m - 1) // m) * m


def _pick_block_n(n):
    # Lane-dense output tile: multiple of 128 when possible, else full extent.
    if n % 128 == 0:
        for c in (512, 384, 256, 128):
            if n % c == 0:
                return c
    return n


def _pick_seq_tile(n, cap=128):
    for c in (cap, 256, 128, 64, 32, 16, 8):
        if c <= n and n % c == 0:
            return c
    return n


def _pick_bh_tile(bh, tq, tk, d, itemsize, budget=16 << 20):
    """Largest divisor of bh whose per-step VMEM footprint fits the budget."""
    per_head = (
        2 * (tq * d + 2 * tk * d) * itemsize   # double-buffered q, k, v blocks
        + 2 * tq * d * itemsize                # double-buffered output block
        + 4 * tq * (d + 2)                     # f32 scratch (m, l, acc)
    )
    max_bh = max(1, budget // max(per_head, 1))
    best = 1
    for c in range(1, bh + 1):
        if bh % c == 0 and c <= max_bh:
            best = c
    return best


# ---------------------------------------------------------------------------
# Linear: y = x @ W (+ b)   (x: [M, K], W: [K, N], b: [N] or None)
# ---------------------------------------------------------------------------
def _linear_bias_kernel(x_ref, w_ref, b_ref, o_ref):
    acc = jnp.dot(x_ref[...], w_ref[...], preferred_element_type=jnp.float32)
    o_ref[...] = (acc + b_ref[...].astype(jnp.float32)).astype(o_ref.dtype)


def _linear_nobias_kernel(x_ref, w_ref, o_ref):
    o_ref[...] = jnp.dot(
        x_ref[...], w_ref[...], preferred_element_type=jnp.float32
    ).astype(o_ref.dtype)


def linear(x2, w, b=None, *, block_m_max=256):
    M, K = x2.shape
    K2, N = w.shape
    assert K == K2
    block_m = min(block_m_max, _round_up(M, 8))
    M_pad = _round_up(M, block_m)
    if M_pad != M:
        x2 = jnp.pad(x2, ((0, M_pad - M), (0, 0)))
    block_n = _pick_block_n(N)

    grid = (M_pad // block_m, N // block_n)
    itemsize = jnp.dtype(x2.dtype).itemsize
    cost = pl.CostEstimate(
        flops=2 * M_pad * K * N,
        transcendentals=0,
        bytes_accessed=(M_pad * K + K * N + M_pad * N + N) * itemsize,
    )

    in_specs = [
        pl.BlockSpec((block_m, K), lambda i, j: (i, 0)),      # x row tile
        pl.BlockSpec((K, block_n), lambda i, j: (0, j)),      # weight col tile
    ]
    args = [x2, w]
    if b is not None:
        in_specs.append(pl.BlockSpec((1, block_n), lambda i, j: (0, j)))
        args.append(b.reshape(1, N))
        kernel = _linear_bias_kernel
    else:
        kernel = _linear_nobias_kernel

    out = pl.pallas_call(
        kernel,
        out_shape=jax.ShapeDtypeStruct((M_pad, N), x2.dtype),
        grid_spec=pltpu.PrefetchScalarGridSpec(
            num_scalar_prefetch=0,
            grid=grid,
            in_specs=in_specs,
            out_specs=pl.BlockSpec((block_m, block_n), lambda i, j: (i, j)),
        ),
        compiler_params=pltpu.CompilerParams(
            dimension_semantics=("parallel", "parallel"),
            vmem_limit_bytes=48 * 1024 * 1024,
        ),
        cost_estimate=cost,
    )(*args)
    return out[:M]


# ---------------------------------------------------------------------------
# Flash-style multi-head attention core (heads batched per grid step).
#   q, k, v: [B*H, N, d]  ->  out: [B*H, N, d]
# ---------------------------------------------------------------------------
def _flash_kernel(q_ref, k_ref, v_ref, o_ref, m_sc, l_sc, acc_sc, *, scale):
    ki = pl.program_id(2)

    @pl.when(ki == 0)
    def _():
        m_sc[...] = jnp.full_like(m_sc, -jnp.inf)
        l_sc[...] = jnp.zeros_like(l_sc)
        acc_sc[...] = jnp.zeros_like(acc_sc)

    q = q_ref[...]            # (bh, tq, d)
    k = k_ref[...]            # (bh, tk, d)
    v = v_ref[...]            # (bh, tk, d)

    # scores = (q @ k^T) * scale, f32 accumulation on the MXU (batched over heads).
    s = jnp.einsum("bqd,bkd->bqk", q, k,
                   preferred_element_type=jnp.float32) * scale

    m_prev = m_sc[...]
    m_new = jnp.maximum(m_prev, s.max(axis=-1, keepdims=True))
    alpha = jnp.exp(m_prev - m_new)
    p = jnp.exp(s - m_new)
    l_sc[...] = alpha * l_sc[...] + p.sum(axis=-1, keepdims=True)
    acc_sc[...] = alpha * acc_sc[...] + jnp.einsum(
        "bqk,bkd->bqd", p.astype(v.dtype), v,
        preferred_element_type=jnp.float32)
    m_sc[...] = m_new

    @pl.when(ki == pl.num_programs(2) - 1)
    def _():
        # Exact division in the finalize (runs once per q-tile; negligible cost,
        # keeps accuracy tight).
        o_ref[...] = (acc_sc[...] / l_sc[...]).astype(o_ref.dtype)


def flash_attention(q3, k3, v3, *, scale):
    BH, N, d = q3.shape
    assert N % 8 == 0, "sequence length must be a multiple of 8"
    # TODO(synk): mask ragged kv/q tails instead of requiring tile divisibility.
    tq = _pick_seq_tile(N)
    tk = _pick_seq_tile(N)
    itemsize = jnp.dtype(q3.dtype).itemsize
    bh = _pick_bh_tile(BH, tq, tk, d, itemsize)
    grid = (BH // bh, N // tq, N // tk)

    cost = pl.CostEstimate(
        flops=4 * BH * N * N * d,
        transcendentals=BH * N * N,
        bytes_accessed=4 * BH * N * d * itemsize,
    )

    return pl.pallas_call(
        functools.partial(_flash_kernel, scale=scale),
        out_shape=jax.ShapeDtypeStruct((BH, N, d), q3.dtype),
        grid_spec=pltpu.PrefetchScalarGridSpec(
            num_scalar_prefetch=0,
            grid=grid,
            in_specs=[
                pl.BlockSpec((bh, tq, d), lambda b, qi, ki: (b, qi, 0)),
                pl.BlockSpec((bh, tk, d), lambda b, qi, ki: (b, ki, 0)),
                pl.BlockSpec((bh, tk, d), lambda b, qi, ki: (b, ki, 0)),
            ],
            out_specs=pl.BlockSpec((bh, tq, d), lambda b, qi, ki: (b, qi, 0)),
            scratch_shapes=[
                pltpu.VMEM((bh, tq, 1), jnp.float32),   # running max
                pltpu.VMEM((bh, tq, 1), jnp.float32),   # running denom
                pltpu.VMEM((bh, tq, d), jnp.float32),   # output accumulator
            ],
        ),
        compiler_params=pltpu.CompilerParams(
            dimension_semantics=("parallel", "parallel", "arbitrary"),
            vmem_limit_bytes=48 * 1024 * 1024,
        ),
        cost_estimate=cost,
    )(q3, k3, v3)


# ---------------------------------------------------------------------------
# Full Attention forward (matches the PyTorch module; dropout p=0 is a no-op).
# ---------------------------------------------------------------------------
@functools.partial(jax.jit, static_argnames=("heads", "dim_head"))
def attention_forward(x, w_qkv, w_out, b_out, *, heads, dim_head):
    B, N, D = x.shape
    inner = heads * dim_head
    scale = dim_head ** (-0.5)

    # to_qkv (no bias)
    x2 = x.reshape(B * N, D)
    qkv = linear(x2, w_qkv)                               # [B*N, 3*inner]

    # chunk + rearrange 'b n (h d) -> (b h) n d'  (layout plumbing, outside kernels)
    qkv = qkv.reshape(B, N, 3, heads, dim_head)
    q = qkv[:, :, 0].transpose(0, 2, 1, 3).reshape(B * heads, N, dim_head)
    k = qkv[:, :, 1].transpose(0, 2, 1, 3).reshape(B * heads, N, dim_head)
    v = qkv[:, :, 2].transpose(0, 2, 1, 3).reshape(B * heads, N, dim_head)

    o = flash_attention(q, k, v, scale=scale)             # [B*heads, N, d]

    # rearrange '(b h) n d -> b n (h d)'
    o = o.reshape(B, heads, N, dim_head).transpose(0, 2, 1, 3).reshape(B * N, inner)

    # to_out: Linear(inner, dim) + Dropout(0) (project_out=True for this config)
    y = linear(o, w_out, b_out)                           # [B*N, D]
    return y.reshape(B, N, D)


if __name__ == "__main__":
    key = jax.random.PRNGKey(0)
    kx, k1, k2, k3 = jax.random.split(key, 4)

    B, N, dim = 2, 8, 32
    heads, dim_head = 8, 64          # module defaults -> inner_dim = 512
    inner = heads * dim_head

    x = jax.random.normal(kx, (B, N, dim), dtype=jnp.float32)

    # torch.nn.Linear default init, stored transposed as [in, out].
    bound_qkv = 1.0 / math.sqrt(dim)
    w_qkv = jax.random.uniform(k1, (dim, 3 * inner), jnp.float32, -bound_qkv, bound_qkv)
    bound_out = 1.0 / math.sqrt(inner)
    w_out = jax.random.uniform(k2, (inner, dim), jnp.float32, -bound_out, bound_out)
    b_out = jax.random.uniform(k3, (dim,), jnp.float32, -bound_out, bound_out)

    out = attention_forward(x, w_qkv, w_out, b_out, heads=heads, dim_head=dim_head)
    out = jax.block_until_ready(out)

    # Plain-JAX reference (same semantics as the PyTorch module).
    qkv = x @ w_qkv
    q_r, k_r, v_r = jnp.split(qkv, 3, axis=-1)

    def split_heads(t):
        return t.reshape(B, N, heads, dim_head).transpose(0, 2, 1, 3)

    q_r, k_r, v_r = map(split_heads, (q_r, k_r, v_r))
    dots = jnp.einsum("bhnd,bhmd->bhnm", q_r, k_r) * (dim_head ** -0.5)
    attn = jax.nn.softmax(dots, axis=-1)
    o_r = jnp.einsum("bhnm,bhmd->bhnd", attn, v_r)
    o_r = o_r.transpose(0, 2, 1, 3).reshape(B, N, inner)
    ref = o_r @ w_out + b_out

    assert out.shape == (B, N, dim)
    err = float(jnp.max(jnp.abs(out - ref)))
    assert jnp.allclose(out, ref, atol=1e-4, rtol=1e-4), err
    print("KERNEL_OK")
</pallas_src>

<mosaic_0001>
module attributes {stable_mosaic.version = 11 : i64} {
  func.func @_linear_nobias_kernel(%arg0: i32, %arg1: i32, %arg2: memref<16x32xf32, #tpu.memory_space<vmem>>, %arg3: memref<32x512xf32, #tpu.memory_space<vmem>>, %arg4: memref<16x512xf32, #tpu.memory_space<vmem>>) attributes {dimension_semantics = [#tpu.dimension_semantics<parallel>, #tpu.dimension_semantics<parallel>], iteration_bounds = array<i64: 1, 3>, scalar_prefetch = 0 : i64, scratch_operands = 0 : i64, tpu.core_type = #tpu.core_type<tc>, window_params = [{transform_indices = @transform_0, window_bounds = array<i64: 16, 32>}, {transform_indices = @transform_1, window_bounds = array<i64: 32, 512>}, {transform_indices = @transform_2, window_bounds = array<i64: 16, 512>}]} {
    %c0 = arith.constant 0 : index
    %c0_0 = arith.constant 0 : index
    %0 = vector.load %arg2[%c0, %c0_0] : memref<16x32xf32, #tpu.memory_space<vmem>>, vector<16x32xf32>
    %c0_1 = arith.constant 0 : index
    %c0_2 = arith.constant 0 : index
    %1 = vector.load %arg3[%c0_1, %c0_2] : memref<32x512xf32, #tpu.memory_space<vmem>>, vector<32x512xf32>
    %cst = arith.constant dense<0.000000e+00> : vector<16x512xf32>
    %2 = tpu.matmul %0, %1, %cst {dimension_numbers = #tpu.dot_dimension_numbers<[1], [0], [0], [1], [0, 0, 1, 1], [], []>} : vector<16x32xf32>, vector<32x512xf32>, vector<16x512xf32> -> vector<16x512xf32>
    %c0_3 = arith.constant 0 : index
    %c0_4 = arith.constant 0 : index
    %3 = vector.load %arg4[%c0_3, %c0_4] : memref<16x512xf32, #tpu.memory_space<vmem>>, vector<16x512xf32>
    tpu.vector_store %arg4[%c0_3, %c0_4], %2 {strides = array<i32>} : memref<16x512xf32, #tpu.memory_space<vmem>>, vector<16x512xf32>,
    return
  }
  func.func @transform_0(%arg0: i32, %arg1: i32) -> (i32, i32) {
    %c0_i32 = arith.constant 0 : i32
    %c0_i32_0 = arith.constant 0 : i32
    return %arg0, %c0_i32 : i32, i32
  }
  func.func @transform_1(%arg0: i32, %arg1: i32) -> (i32, i32) {
    %c0_i32 = arith.constant 0 : i32
    %c0_i32_0 = arith.constant 0 : i32
    return %c0_i32, %arg1 : i32, i32
  }
  func.func @transform_2(%arg0: i32, %arg1: i32) -> (i32, i32) {
    %c0_i32 = arith.constant 0 : i32
    return %arg0, %arg1 : i32, i32
  }
}

module attributes {stable_mosaic.version = 11 : i64} {
  func.func @_flash_kernel(%arg0: i32, %arg1: i32, %arg2: i32, %arg3: memref<16x8x64xf32, #tpu.memory_space<vmem>>, %arg4: memref<16x8x64xf32, #tpu.memory_space<vmem>>, %arg5: memref<16x8x64xf32, #tpu.memory_space<vmem>>, %arg6: memref<16x8x64xf32, #tpu.memory_space<vmem>>, %arg7: memref<16x8x1xf32, #tpu.memory_space<vmem>>, %arg8: memref<16x8x1xf32, #tpu.memory_space<vmem>>, %arg9: memref<16x8x64xf32, #tpu.memory_space<vmem>>) attributes {dimension_semantics = [#tpu.dimension_semantics<parallel>, #tpu.dimension_semantics<parallel>, #tpu.dimension_semantics<arbitrary>], iteration_bounds = array<i64: 1, 1, 1>, scalar_prefetch = 0 : i64, scratch_operands = 3 : i64, tpu.core_type = #tpu.core_type<tc>, window_params = [{transform_indices = @transform_0, window_bounds = array<i64: 16, 8, 64>}, {transform_indices = @transform_1, window_bounds = array<i64: 16, 8, 64>}, {transform_indices = @transform_2, window_bounds = array<i64: 16, 8, 64>}, {transform_indices = @transform_3, window_bounds = array<i64: 16, 8, 64>}]} {
    %c0_i32 = arith.constant 0 : i32
    %0 = arith.cmpi eq, %arg2, %c0_i32 : i32
    %1 = arith.extui %0 : i1 to i32
    %c0_i32_0 = arith.constant 0 : i32
    %2 = arith.cmpi ne, %1, %c0_i32_0 : i32
    scf.if %2 {
      %cst_33 = arith.constant 0xFF800000 : f32
      %34 = vector.broadcast %cst_33 : f32 to vector<16x8x1xf32>
      %c0_34 = arith.constant 0 : index
      %c0_35 = arith.constant 0 : index
      %c0_36 = arith.constant 0 : index
      %35 = vector.load %arg7[%c0_34, %c0_35, %c0_36] : memref<16x8x1xf32, #tpu.memory_space<vmem>>, vector<16x8x1xf32>
      tpu.vector_store %arg7[%c0_34, %c0_35, %c0_36], %34 {strides = array<i32>} : memref<16x8x1xf32, #tpu.memory_space<vmem>>, vector<16x8x1xf32>,
      %cst_37 = arith.constant 0.000000e+00 : f32
      %36 = vector.broadcast %cst_37 : f32 to vector<16x8x1xf32>
      %c0_38 = arith.constant 0 : index
      %c0_39 = arith.constant 0 : index
      %c0_40 = arith.constant 0 : index
      %37 = vector.load %arg8[%c0_38, %c0_39, %c0_40] : memref<16x8x1xf32, #tpu.memory_space<vmem>>, vector<16x8x1xf32>
      tpu.vector_store %arg8[%c0_38, %c0_39, %c0_40], %36 {strides = array<i32>} : memref<16x8x1xf32, #tpu.memory_space<vmem>>, vector<16x8x1xf32>,
      %cst_41 = arith.constant 0.000000e+00 : f32
      %38 = vector.broadcast %cst_41 : f32 to vector<16x8x64xf32>
      %c0_42 = arith.constant 0 : index
      %c0_43 = arith.constant 0 : index
      %c0_44 = arith.constant 0 : index
      %39 = vector.load %arg9[%c0_42, %c0_43, %c0_44] : memref<16x8x64xf32, #tpu.memory_space<vmem>>, vector<16x8x64xf32>
      tpu.vector_store %arg9[%c0_42, %c0_43, %c0_44], %38 {strides = array<i32>} : memref<16x8x64xf32, #tpu.memory_space<vmem>>, vector<16x8x64xf32>,
    } else {
    }
    %c0 = arith.constant 0 : index
    %c0_1 = arith.constant 0 : index
    %c0_2 = arith.constant 0 : index
    %3 = vector.load %arg3[%c0, %c0_1, %c0_2] : memref<16x8x64xf32, #tpu.memory_space<vmem>>, vector<16x8x64xf32>
    %c0_3 = arith.constant 0 : index
    %c0_4 = arith.constant 0 : index
    %c0_5 = arith.constant 0 : index
    %4 = vector.load %arg4[%c0_3, %c0_4, %c0_5] : memref<16x8x64xf32, #tpu.memory_space<vmem>>, vector<16x8x64xf32>
    %c0_6 = arith.constant 0 : index
    %c0_7 = arith.constant 0 : index
    %c0_8 = arith.constant 0 : index
    %5 = vector.load %arg5[%c0_6, %c0_7, %c0_8] : memref<16x8x64xf32, #tpu.memory_space<vmem>>, vector<16x8x64xf32>
    "tpu.trace_start"() <{level = 10 : i32, message = "bqd,bkd->bqk"}> : () -> ()
    %cst = arith.constant dense<0.000000e+00> : vector<16x8x8xf32>
    %6 = tpu.matmul %3, %4, %cst {dimension_numbers = #tpu.dot_dimension_numbers<[2], [2], [1], [1], [0, 0, 0, 1, 1, 1], [0], [0]>} : vector<16x8x64xf32>, vector<16x8x64xf32>, vector<16x8x8xf32> -> vector<16x8x8xf32>
    "tpu.trace_stop"() : () -> ()
    %cst_9 = arith.constant 1.250000e-01 : f32
    %7 = vector.broadcast %cst_9 : f32 to vector<16x8x8xf32>
    %8 = arith.mulf %6, %7 : vector<16x8x8xf32>
    %c0_10 = arith.constant 0 : index
    %c0_11 = arith.constant 0 : index
    %c0_12 = arith.constant 0 : index
    %9 = vector.load %arg7[%c0_10, %c0_11, %c0_12] : memref<16x8x1xf32, #tpu.memory_space<vmem>>, vector<16x8x1xf32>
    %cst_13 = arith.constant dense<0xFF800000> : vector<16x8xf32>
    %10 = vector.multi_reduction <maximumf>, %8, %cst_13 [2] : vector<16x8x8xf32> to vector<16x8xf32>
    %11 = vector.shape_cast %10 : vector<16x8xf32> to vector<16x8x1xf32>
    %12 = arith.maximumf %9, %11 : vector<16x8x1xf32>
    %13 = arith.subf %9, %12 : vector<16x8x1xf32>
    %14 = math.exp %13 : vector<16x8x1xf32>
    %15 = vector.broadcast %12 : vector<16x8x1xf32> to vector<16x8x8xf32>
    %16 = arith.subf %8, %15 : vector<16x8x8xf32>
    %17 = math.exp %16 : vector<16x8x8xf32>
    %c0_14 = arith.constant 0 : index
    %c0_15 = arith.constant 0 : index
    %c0_16 = arith.constant 0 : index
    %18 = vector.load %arg8[%c0_14, %c0_15, %c0_16] : memref<16x8x1xf32, #tpu.memory_space<vmem>>, vector<16x8x1xf32>
    %19 = arith.mulf %14, %18 : vector<16x8x1xf32>
    %cst_17 = arith.constant dense<0.000000e+00> : vector<16x8xf32>
    %20 = vector.multi_reduction <add>, %17, %cst_17 [2] : vector<16x8x8xf32> to vector<16x8xf32>
    %21 = vector.shape_cast %20 : vector<16x8xf32> to vector<16x8x1xf32>
    %22 = arith.addf %19, %21 : vector<16x8x1xf32>
    %c0_18 = arith.constant 0 : index
    %c0_19 = arith.constant 0 : index
    %c0_20 = arith.constant 0 : index
    %23 = vector.load %arg8[%c0_18, %c0_19, %c0_20] : memref<16x8x1xf32, #tpu.memory_space<vmem>>, vector<16x8x1xf32>
    tpu.vector_store %arg8[%c0_18, %c0_19, %c0_20], %22 {strides = array<i32>} : memref<16x8x1xf32, #tpu.memory_space<vmem>>, vector<16x8x1xf32>,
    %c0_21 = arith.constant 0 : index
    %c0_22 = arith.constant 0 : index
    %c0_23 = arith.constant 0 : index
    %24 = vector.load %arg9[%c0_21, %c0_22, %c0_23] : memref<16x8x64xf32, #tpu.memory_space<vmem>>, vector<16x8x64xf32>
    %25 = vector.broadcast %14 : vector<16x8x1xf32> to vector<16x8x64xf32>
    %26 = arith.mulf %25, %24 : vector<16x8x64xf32>
    "tpu.trace_start"() <{level = 10 : i32, message = "bqk,bkd->bqd"}> : () -> ()
    %cst_24 = arith.constant dense<0.000000e+00> : vector<16x8x64xf32>
    %27 = tpu.matmul %17, %5, %cst_24 {dimension_numbers = #tpu.dot_dimension_numbers<[2], [1], [1], [2], [0, 0, 0, 1, 1, 2], [0], [0]>} : vector<16x8x8xf32>, vector<16x8x64xf32>, vector<16x8x64xf32> -> vector<16x8x64xf32>
    "tpu.trace_stop"() : () -> ()
    %28 = arith.addf %26, %27 : vector<16x8x64xf32>
    %c0_25 = arith.constant 0 : index
    %c0_26 = arith.constant 0 : index
    %c0_27 = arith.constant 0 : index
    %29 = vector.load %arg9[%c0_25, %c0_26, %c0_27] : memref<16x8x64xf32, #tpu.memory_space<vmem>>, vector<16x8x64xf32>
    tpu.vector_store %arg9[%c0_25, %c0_26, %c0_27], %28 {strides = array<i32>} : memref<16x8x64xf32, #tpu.memory_space<vmem>>, vector<16x8x64xf32>,
    %c0_28 = arith.constant 0 : index
    %c0_29 = arith.constant 0 : index
    %c0_30 = arith.constant 0 : index
    %30 = vector.load %arg7[%c0_28, %c0_29, %c0_30] : memref<16x8x1xf32, #tpu.memory_space<vmem>>, vector<16x8x1xf32>
    tpu.vector_store %arg7[%c0_28, %c0_29, %c0_30], %12 {strides = array<i32>} : memref<16x8x1xf32, #tpu.memory_space<vmem>>, vector<16x8x1xf32>,
    %c0_i32_31 = arith.constant 0 : i32
    %31 = arith.cmpi eq, %arg2, %c0_i32_31 : i32
    %32 = arith.extui %31 : i1 to i32
    %c0_i32_32 = arith.constant 0 : i32
    %33 = arith.cmpi ne, %32, %c0_i32_32 : i32
    scf.if %33 {
      %c0_33 = arith.constant 0 : index
      %c0_34 = arith.constant 0 : index
      %c0_35 = arith.constant 0 : index
      %34 = vector.load %arg9[%c0_33, %c0_34, %c0_35] : memref<16x8x64xf32, #tpu.memory_space<vmem>>, vector<16x8x64xf32>
      %c0_36 = arith.constant 0 : index
      %c0_37 = arith.constant 0 : index
      %c0_38 = arith.constant 0 : index
      %35 = vector.load %arg8[%c0_36, %c0_37, %c0_38] : memref<16x8x1xf32, #tpu.memory_space<vmem>>, vector<16x8x1xf32>
      %36 = vector.broadcast %35 : vector<16x8x1xf32> to vector<16x8x64xf32>
      %37 = arith.divf %34, %36 : vector<16x8x64xf32>
      %c0_39 = arith.constant 0 : index
      %c0_40 = arith.constant 0 : index
      %c0_41 = arith.constant 0 : index
      %38 = vector.load %arg6[%c0_39, %c0_40, %c0_41] : memref<16x8x64xf32, #tpu.memory_space<vmem>>, vector<16x8x64xf32>
      tpu.vector_store %arg6[%c0_39, %c0_40, %c0_41], %37 {strides = array<i32>} : memref<16x8x64xf32, #tpu.memory_space<vmem>>, vector<16x8x64xf32>,
    } else {
    }
    return
  }
  func.func @transform_0(%arg0: i32, %arg1: i32, %arg2: i32) -> (i32, i32, i32) {
    %c0_i32 = arith.constant 0 : i32
    %c0_i32_0 = arith.constant 0 : i32
    return %arg0, %arg1, %c0_i32 : i32, i32, i32
  }
  func.func @transform_1(%arg0: i32, %arg1: i32, %arg2: i32) -> (i32, i32, i32) {
    %c0_i32 = arith.constant 0 : i32
    %c0_i32_0 = arith.constant 0 : i32
    return %arg0, %arg2, %c0_i32 : i32, i32, i32
  }
  func.func @transform_2(%arg0: i32, %arg1: i32, %arg2: i32) -> (i32, i32, i32) {
    %c0_i32 = arith.constant 0 : i32
    %c0_i32_0 = arith.constant 0 : i32
    return %arg0, %arg2, %c0_i32 : i32, i32, i32
  }
  func.func @transform_3(%arg0: i32, %arg1: i32, %arg2: i32) -> (i32, i32, i32) {
    %c0_i32 = arith.constant 0 : i32
    %c0_i32_0 = arith.constant 0 : i32
    return %arg0, %arg1, %c0_i32 : i32, i32, i32
  }
}

module attributes {stable_mosaic.version = 11 : i64} {
  func.func @_linear_bias_kernel(%arg0: i32, %arg1: i32, %arg2: memref<16x512xf32, #tpu.memory_space<vmem>>, %arg3: memref<512x32xf32, #tpu.memory_space<vmem>>, %arg4: memref<1x32xf32, #tpu.memory_space<vmem>>, %arg5: memref<16x32xf32, #tpu.memory_space<vmem>>) attributes {dimension_semantics = [#tpu.dimension_semantics<parallel>, #tpu.dimension_semantics<parallel>], iteration_bounds = array<i64: 1, 1>, scalar_prefetch = 0 : i64, scratch_operands = 0 : i64, tpu.core_type = #tpu.core_type<tc>, window_params = [{transform_indices = @transform_0, window_bounds = array<i64: 16, 512>}, {transform_indices = @transform_1, window_bounds = array<i64: 512, 32>}, {transform_indices = @transform_2, window_bounds = array<i64: 1, 32>}, {transform_indices = @transform_3, window_bounds = array<i64: 16, 32>}]} {
    %c0 = arith.constant 0 : index
    %c0_0 = arith.constant 0 : index
    %0 = vector.load %arg2[%c0, %c0_0] : memref<16x512xf32, #tpu.memory_space<vmem>>, vector<16x512xf32>
    %c0_1 = arith.constant 0 : index
    %c0_2 = arith.constant 0 : index
    %1 = vector.load %arg3[%c0_1, %c0_2] : memref<512x32xf32, #tpu.memory_space<vmem>>, vector<512x32xf32>
    %cst = arith.constant dense<0.000000e+00> : vector<16x32xf32>
    %2 = tpu.matmul %0, %1, %cst {dimension_numbers = #tpu.dot_dimension_numbers<[1], [0], [0], [1], [0, 0, 1, 1], [], []>} : vector<16x512xf32>, vector<512x32xf32>, vector<16x32xf32> -> vector<16x32xf32>
    %c0_3 = arith.constant 0 : index
    %c0_4 = arith.constant 0 : index
    %3 = vector.load %arg4[%c0_3, %c0_4] : memref<1x32xf32, #tpu.memory_space<vmem>>, vector<1x32xf32>
    %4 = vector.broadcast %3 : vector<1x32xf32> to vector<16x32xf32>
    %5 = arith.addf %2, %4 : vector<16x32xf32>
    %c0_5 = arith.constant 0 : index
    %c0_6 = arith.constant 0 : index
    %6 = vector.load %arg5[%c0_5, %c0_6] : memref<16x32xf32, #tpu.memory_space<vmem>>, vector<16x32xf32>
    tpu.vector_store %arg5[%c0_5, %c0_6], %5 {strides = array<i32>} : memref<16x32xf32, #tpu.memory_space<vmem>>, vector<16x32xf32>,
    return
  }
  func.func @transform_0(%arg0: i32, %arg1: i32) -> (i32, i32) {
    %c0_i32 = arith.constant 0 : i32
    %c0_i32_0 = arith.constant 0 : i32
    return %arg0, %c0_i32 : i32, i32
  }
  func.func @transform_1(%arg0: i32, %arg1: i32) -> (i32, i32) {
    %c0_i32 = arith.constant 0 : i32
    %c0_i32_0 = arith.constant 0 : i32
    return %c0_i32, %arg1 : i32, i32
  }
  func.func @transform_2(%arg0: i32, %arg1: i32) -> (i32, i32) {
    %c0_i32 = arith.constant 0 : i32
    %c0_i32_0 = arith.constant 0 : i32
    return %c0_i32, %arg1 : i32, i32
  }
  func.func @transform_3(%arg0: i32, %arg1: i32) -> (i32, i32) {
    %c0_i32 = arith.constant 0 : i32
    return %arg0, %arg1 : i32, i32
  }
}

</mosaic_0001>

<bundles_post_ra>
// kernel: attention_forward.3
= control target key start
LH: loop header
LB: loop body
LE: loop exit
PB: predicated region body
PF: predicated region fallthrough
CT: control target
= control target key end

     0   :  { %7 = vsyncpa [#allocation3], 0  ;;  %s867_s0 = inlined_call_operand.hbm [shape: f32[16,32], index: 0, kind: input, shape index: {}]   ;;  %s868_s1 = inlined_call_operand.hbm [shape: f32[32,1536], index: 1, kind: input, shape index: {}]   ;;  %s869_s2 = inlined_call_operand.vmem [shape: f32[16,1536], index: 2, kind: output, shape index: {}]  }
   0x1   :  { %8 = vsyncpa [#allocation5], 0 }
   0x2   :  { %10 = vsyncpa [#allocation5 + $0x1], 0  ;;  %s694_s9 = smov 0   ;;  %s696_s10 = smov 0  }
   0x3   :  { %s698_s11 = smov 0   ;;  %s700_s12 = smov 0  }
   0x4   :  { %s702_s13 = smov 0   ;;  %s704_s14 = smov 0  }
   0x5 LB: > { %s459_s15 = sadd.s32 4294967295, %s671_s14   ;;  %p74_p0 = scmp.ne.s32.totalorder %s655_s10, %s651_s9  ;;  %s671_s14 = sphi %s704_s14, %s16_s14   ;;  %s667_s13 = sphi %s702_s13, %s880_s13   ;;  %s663_s12 = sphi %s700_s12, %s879_s12   ;;  %s659_s11 = sphi %s698_s11, %s878_s11   ;;  %s655_s10 = sphi %s696_s10, %s877_s10   ;;  %s651_s9 = sphi %s694_s9, %s876_s9  }
   0x6   : > { %p724_p1 = scmp.eq.s32.totalorder %s459_s15, 0  ;;  %p728_p2 = scmp.eq.s32.totalorder %s459_s15, 2 }
   0x7   : > { %p461_p3 = scmp.ge.s32.totalorder %s671_s14, 1  ;;  %p113_p4 = scmp.lt.s32.totalorder %s671_s14, 4 }
   0x8   : > { %p736_p5 = por %p724_p1, %p74_p0  ;;  %s127_s22 = sshll.u32 %s867_s0, 4  ;;  %s128_s22 = int_to_ptr.hbm [resolvable:$true] %s127_s22 }
   0x9   : > { %p740_p6 = pnand %p461_p3, %p113_p4  ;;  %s673_s23 = smov [#allocation2]  }
   0xa   : > { %s129_s24 = sshll.u32 %s673_s23, 4  ;;  %s674_s25 = smov 128   ;;  %s130_s24 = int_to_ptr.vmem [resolvable:$true] %s129_s24 }
   0xb   : > { %p492_p7 = pneg %p740_p6  ;;  %s675_s26 = smov 8  }
   0xc   : > { %s25_s27 = sadd.s32 1, %s667_s13  ;;  %s61_s28 = sadd.s32 1, %s659_s11 }
   0xd   : > { %p493_p8 = pnand %p492_p7, %p724_p1  ;;  %p26_p9 = scmp.ge.s32.totalorder %s25_s27, 3 }
   0xe   : > { %p68_p10 = scmp.ne.s32.totalorder %s659_s11, %s655_s10  ;;  %p69_p11 = scmp.eq.s32.totalorder %s671_s14, 0 }
   0xf   : > { %495 = dma.hbm_to_vmem [thread:$0]  (!%p493_p8), %s128_s22, 256, %s130_s24, [#allocation3], %s674_s25, %s674_s25, %s675_s26  }
  0x10   : > { %p501_p12 = scmp.lt.s32.totalorder %s671_s14, 3  ;;  %s882_s27 = smov (%p26_p9, %s25_s27), 0 }
  0x11   : > { %p759_p13 = por %p69_p11, %p68_p10  ;;  %p765_p0 = por %p728_p2, %p68_p10 }
  0x12   : > { %s58_s3 = ssub.s32 %s667_s13, %s882_s27  ;;  %s143_s4 = sand.u32 1, %s659_s11  }
  0x13   : > { %p59_p3 = scmp.eq.s32.totalorder %s58_s3, 0  ;;  %s464_s5 = sshll.u32 %s143_s4, 7 }
  0x14   : > { %s484_s6 = sshll.u32 %s667_s13, 5  ;;  %s147_s21 = scalar_lea.vmem [#allocation4], %s464_s5 }
  0x15   : > { %s774_s7 = scalar_select %p59_p3, %s659_s11, %s61_s28  }
  0x16   : > { %s152_s15 = scalar_lea.hbm %s868_s1, %s484_s6  ;;  %s155_s22 = sshll.u32 %s147_s21, 4  ;;  %s156_s22 = int_to_ptr.vmem [resolvable:$true] %s155_s22 }
  0x17   : > { %s153_s20 = sshll.u32 %s152_s15, 4  ;;  %p497_p2 = pnand %p501_p12, %p759_p13  ;;  %s154_s20 = int_to_ptr.hbm [resolvable:$true] %s153_s20 }
  0x18   : > { %s144_s17 = scalar_lea.sflag [#allocation5], %s143_s4  ;;  %s676_s23 = smov 1536  }
  0x19   : > { %s677_s24 = smov 512   ;;  %s678_s25 = smov 32  }
  0x1a   : > { %499 = dma.hbm_to_vmem [thread:$0]  (!%p497_p2), %s154_s20, 2048, %s156_s22, %s144_s17, %s676_s23, %s677_s24, %s678_s25  }
  0x1b   : > { %167 = sbr.rel (%p740_p6) target bundleno = 195 (0xc3), region = 28 }
  0x20   : > { %642 = dma.done.wait (%p724_p1), [#allocation3], 256  }
  0x21   : > { %644 = vsyncadd (%p724_p1), [#allocation3], 4294967040  ;;  %s790_s26 = sand.u32 1, %s655_s10  }
  0x22   : > { %s469_s28 = sshll.u32 %s790_s26, 7  ;;  %s175_s29 = scalar_lea.sflag [#allocation5], %s790_s26 }
  0x23   : > { %s794_s3 = scalar_lea.vmem [#allocation4], %s469_s28 }
  0x24   : > { %646 = dma.done.wait (%p736_p5), %s175_s29, 2048  }
  0x25   : > { %648 = vsyncadd (%p736_p5), %s175_s29, 4294965248  ;;  %v219_v0 = vld [vmem:[%s794_s3 + $0x70] sm:$0xff]  ;;  %v220_v1 = vld [vmem:[%s794_s3 + $0x78] sm:$0xff]  ;;  %vm221_vm0 = vcmask 261120   ;;  %s470_s16 = sshll.u32 %s790_s26, 6  ;;  %s485_s19 = sshll.u32 (%p765_p0), %s663_s12, 5 }
  0x26   : > { %v215_v2 = vld [vmem:[%s794_s3 + $0x50] sm:$0xff]  ;;  %286 = vmatpush.msra.mxu2 %v219_v0  ;;  %309 = vmatpush.msra.mxu3 %v220_v1  ;;  %v216_v3 = vld [vmem:[%s794_s3 + $0x58] sm:$0xff]  ;;  %v217_v6 = vld [vmem:[%s794_s3 + $0x60] sm:$0xff]  ;;  %s825_s18 = scalar_lea.vmem [#allocation6], %s470_s16  ;;  %s340_s6 = scalar_lea.vmem (%p765_p0), %s869_s2, %s485_s19 }
  0x27   : > { %v211_v4 = vld [vmem:[%s794_s3 + $0x30] sm:$0xff]  ;;  %v212_v5 = vld [vmem:[%s794_s3 + $0x38] sm:$0xff]  ;;  %v218_v7 = vld [vmem:[%s794_s3 + $0x68] sm:$0xff]  ;;  %240 = vmatpush.msra.mxu0 %v217_v6 }
  0x28   : > { %287 = vmatpush.msra.mxu2 %v215_v2  ;;  %310 = vmatpush.msra.mxu3 %v216_v3  ;;  %v213_v8 = vld [vmem:[%s794_s3 + $0x40] sm:$0xff]  ;;  %v207_v9 = vld [vmem:[%s794_s3 + $0x10] sm:$0xff]  ;;  %v208_v10 = vld [vmem:[%s794_s3 + $0x18] sm:$0xff] }
  0x29   : > { %263 = vmatpush.msra.mxu1 %v218_v7  ;;  %v214_v11 = vld [vmem:[%s794_s3 + $0x48] sm:$0xff]  ;;  %v203_v12 = vld [vmem:[#allocation2] sm:$0xff]  ;;  %241 = vmatpush.msra.mxu0 %v213_v8  ;;  %v209_v13 = vld [vmem:[%s794_s3 + $0x20] sm:$0xff] }
  0x2a   : > { %288 = vmatpush.msra.mxu2 %v211_v4  ;;  %311 = vmatpush.msra.mxu3 %v212_v5  ;;  %v210_v14 = vld [vmem:[%s794_s3 + $0x28] sm:$0xff]  ;;  %v205_v15 = vld [vmem:[%s794_s3] sm:$0xff]  ;;  %v204_v17 = vld [vmem:[#allocation2 + $0x8] sm:$0xff] }
  0x2b   : > { %264 = vmatpush.msra.mxu1 %v214_v11  ;;  %v206_v16 = vld [vmem:[%s794_s3 + $0x8] sm:$0xff]  ;;  %242 = vmatpush.msra.mxu0 %v209_v13 }
  0x2c   : > { %289 = vmatpush.msra.mxu2 %v207_v9  ;;  %312 = vmatpush.msra.mxu3 %v208_v10 }
  0x2d   : > { %475 = vmatmul.msk.f32.vlgmr.msra.gmra.mxu2 %vm221_vm0, %v203_v12  ;;  %477 = vmatmul.msk.f32.vlgmr.msra.gmra.mxu3 %vm221_vm0, %v203_v12 }
  0x2e   : > { %265 = vmatpush.msra.mxu1 %v210_v14  ;;  %243 = vmatpush.msra.mxu0 %v205_v15 }
  0x2f   : > { %471 = vmatmul.msk.f32.vlgmr.msra.gmra.mxu0 %vm221_vm0, %v203_v12 }
  0x30   : > { %266 = vmatpush.msra.mxu1 %v206_v16 }
  0x31   : > { %473 = vmatmul.msk.f32.vlgmr.msra.gmra.mxu1 %vm221_vm0, %v203_v12 }
  0x35   : > { %476 = vmatmul.msk.f32.gmra.mxu2 %vm221_vm0, %v204_v17  ;;  %478 = vmatmul.msk.f32.gmra.mxu3 %vm221_vm0, %v204_v17 }
  0x37   : > { %472 = vmatmul.msk.f32.gmra.mxu0 %vm221_vm0, %v204_v17 }
  0x39   : > { %474 = vmatmul.msk.f32.gmra.mxu1 %vm221_vm0, %v204_v17 }
  0xac   : > { %v245_v18 = vpop.f32.mrf.mxu0 }
  0xad   : > { %320 = vst [vmem:[%s825_s18] sm:$0xff] %v245_v18 }
  0xae   : > { %v268_v19 = vpop.f32.mrf.mxu1 }
  0xaf   : > { %321 = vst [vmem:[%s825_s18 + $0x8] sm:$0xff] %v268_v19 }
  0xb0   : > { %v291_v20 = vpop.f32.mrf.mxu2  ;;  %v314_v21 = vpop.f32.mrf.mxu3 }
  0xb1   : > { %322 = vst [vmem:[%s825_s18 + $0x10] sm:$0xff] %v291_v20 }
  0xb2   : > { %323 = vst [vmem:[%s825_s18 + $0x18] sm:$0xff] %v314_v21 }
  0xb4   : > { %v248_v22 = vpop.f32.mrf.mxu0  ;;  %v353_v26 = vld [vmem:[%s825_s18] sm:$0xff] (%p765_p0) }
  0xb5   : > { %324 = vst [vmem:[%s825_s18 + $0x20] sm:$0xff] %v248_v22 }
  0xb6   : > { %v271_v23 = vpop.f32.mrf.mxu1  ;;  %334 = sbr.rel (!%p765_p0) target bundleno = 195 (0xc3), region = 40  ;;  %v355_v27 = vld [vmem:[%s825_s18 + $0x8] sm:$0xff] (%p765_p0)  ;;  %354 = vst [vmem:[%s340_s6] sm:$0xff] (%p765_p0), %v353_v26 }
  0xb7   : > { %325 = vst [vmem:[%s825_s18 + $0x28] sm:$0xff] %v271_v23 }
  0xb8   : > { %v294_v24 = vpop.f32.mrf.mxu2  ;;  %v317_v25 = vpop.f32.mrf.mxu3  ;;  %v357_v28 = vld [vmem:[%s825_s18 + $0x10] sm:$0xff] (%p765_p0)  ;;  %356 = vst [vmem:[%s340_s6 + $0x8] sm:$0xff] (%p765_p0), %v355_v27 }
  0xb9   : > { %326 = vst [vmem:[%s825_s18 + $0x30] sm:$0xff] %v294_v24  ;;  %v359_v29 = vld [vmem:[%s825_s18 + $0x18] sm:$0xff] (%p765_p0) }
  0xba   : > { %327 = vst [vmem:[%s825_s18 + $0x38] sm:$0xff] %v317_v25 }
  0xbb   : > { %358 = vst [vmem:[%s340_s6 + $0x10] sm:$0xff] %v357_v28 }
  0xbc   : > { %v361_v30 = vld [vmem:[%s825_s18 + $0x20] sm:$0xff]  ;;  %360 = vst [vmem:[%s340_s6 + $0x18] sm:$0xff] %v359_v29 }
  0xbd   : > { %362 = vst [vmem:[%s340_s6 + $0x60] sm:$0xff] %v361_v30 }
  0xbe   : > { %v363_v31 = vld [vmem:[%s825_s18 + $0x28] sm:$0xff] }
  0xbf   : > { %364 = vst [vmem:[%s340_s6 + $0x68] sm:$0xff] %v363_v31 }
  0xc0   : > { %v365_v32 = vld [vmem:[%s825_s18 + $0x30] sm:$0xff] }
  0xc1   : > { %v367_v33 = vld [vmem:[%s825_s18 + $0x38] sm:$0xff]  ;;  %366 = vst [vmem:[%s340_s6 + $0x70] sm:$0xff] %v365_v32 }
  0xc2   : > { %368 = vst [vmem:[%s340_s6 + $0x78] sm:$0xff] %v367_v33 }
  0xc3 PF: > { %s16_s14 = sadd.s32 1, %s671_s14   ;;  %s876_s9 = smov %s655_s10 }
  0xc4   : > { %p13_p1 = scmp.ge.s32.totalorder %s16_s14, 5   ;;  %s877_s10 = smov %s659_s11 }
  0xc5   : > { %s878_s11 = smov %s774_s7  ;;  %s879_s12 = smov %s667_s13 }
  0xc6   : > { %s880_s13 = smov %s882_s27  ;;  %15 = sbr.rel (!%p13_p1) target bundleno = 5 (0x5), region = 97 }
  0xcb   :  { %384 = vsyncpa [#allocation3], 1 }
  0xcc   :  { %386 = vsyncpa [#allocation3 + $0x1], 1 }
  0xcd   :  { %387 = vsyncpa [#allocation5], 1 }
  0xce   :  { %389 = vsyncpa [#allocation5 + $0x1], 1 }

// kernel: attention_forward.5
= control target key start
LH: loop header
LB: loop body
LE: loop exit
PB: predicated region body
PF: predicated region fallthrough
CT: control target
= control target key end

     0   :  { %s481_s0 = inlined_call_operand.vmem [shape: f32[16,512], index: 0, kind: input, shape index: {}]   ;;  %s482_s1 = inlined_call_operand.vmem [shape: f32[512,32], index: 1, kind: input, shape index: {}]   ;;  %s483_s2 = inlined_call_operand.vmem [shape: f32[1,32], index: 2, kind: input, shape index: {}]   ;;  %s484_s3 = inlined_call_operand.hbm [shape: f32[16,32], index: 3, kind: output, shape index: {}]  }
   0x1   :  { %v70_v0 = vld [vmem:[%s482_s1 + $0x178] sm:$0xff]  ;;  %v69_v2 = vld [vmem:[%s482_s1 + $0x170] sm:$0xff]  ;;  %v68_v6 = vld [vmem:[%s482_s1 + $0x168] sm:$0xff] }
   0x2   :  { %v38_v1 = vld [vmem:[%s482_s1 + $0x78] sm:$0xff]  ;;  %137 = vmatpush.msra.mxu2 %v70_v0  ;;  %v37_v4 = vld [vmem:[%s482_s1 + $0x70] sm:$0xff]  ;;  %v36_v8 = vld [vmem:[%s482_s1 + $0x68] sm:$0xff] }
   0x3   :  { %91 = vmatpush.msra.mxu0 %v38_v1  ;;  %v86_v3 = vld [vmem:[%s482_s1 + $0x1f8] sm:$0xff]  ;;  %v85_v7 = vld [vmem:[%s482_s1 + $0x1f0] sm:$0xff]  ;;  %v84_v10 = vld [vmem:[%s482_s1 + $0x1e8] sm:$0xff] }
   0x4   :  { %v54_v5 = vld [vmem:[%s482_s1 + $0xf8] sm:$0xff]  ;;  %160 = vmatpush.msra.mxu3 %v86_v3  ;;  %138 = vmatpush.msra.mxu2 %v69_v2  ;;  %v53_v9 = vld [vmem:[%s482_s1 + $0xf0] sm:$0xff]  ;;  %v67_v11 = vld [vmem:[%s482_s1 + $0x160] sm:$0xff] }
   0x5   :  { %114 = vmatpush.msra.mxu1 %v54_v5  ;;  %92 = vmatpush.msra.mxu0 %v37_v4  ;;  %v35_v12 = vld [vmem:[%s482_s1 + $0x60] sm:$0xff]  ;;  %v52_v13 = vld [vmem:[%s482_s1 + $0xe8] sm:$0xff]  ;;  %v66_v16 = vld [vmem:[%s482_s1 + $0x158] sm:$0xff] }
   0x6   :  { %161 = vmatpush.msra.mxu3 %v85_v7  ;;  %139 = vmatpush.msra.mxu2 %v68_v6  ;;  %v83_v14 = vld [vmem:[%s482_s1 + $0x1e0] sm:$0xff]  ;;  %v34_v17 = vld [vmem:[%s482_s1 + $0x58] sm:$0xff]  ;;  %v65_v20 = vld [vmem:[%s482_s1 + $0x150] sm:$0xff] }
   0x7   :  { %115 = vmatpush.msra.mxu1 %v53_v9  ;;  %93 = vmatpush.msra.mxu0 %v36_v8  ;;  %v51_v15 = vld [vmem:[%s482_s1 + $0xe0] sm:$0xff]  ;;  %v82_v18 = vld [vmem:[%s482_s1 + $0x1d8] sm:$0xff]  ;;  %v33_v21 = vld [vmem:[%s482_s1 + $0x50] sm:$0xff] }
   0x8   :  { %162 = vmatpush.msra.mxu3 %v84_v10  ;;  %140 = vmatpush.msra.mxu2 %v67_v11  ;;  %v50_v19 = vld [vmem:[%s482_s1 + $0xd8] sm:$0xff]  ;;  %v81_v22 = vld [vmem:[%s482_s1 + $0x1d0] sm:$0xff]  ;;  %v64_v24 = vld [vmem:[%s482_s1 + $0x148] sm:$0xff] }
   0x9   :  { %116 = vmatpush.msra.mxu1 %v52_v13  ;;  %94 = vmatpush.msra.mxu0 %v35_v12  ;;  %v49_v23 = vld [vmem:[%s482_s1 + $0xd0] sm:$0xff]  ;;  %v32_v25 = vld [vmem:[%s482_s1 + $0x48] sm:$0xff]  ;;  %v63_v28 = vld [vmem:[%s482_s1 + $0x140] sm:$0xff] }
   0xa   :  { %163 = vmatpush.msra.mxu3 %v83_v14  ;;  %141 = vmatpush.msra.mxu2 %v66_v16  ;;  %v80_v26 = vld [vmem:[%s482_s1 + $0x1c8] sm:$0xff]  ;;  %v31_v29 = vld [vmem:[%s482_s1 + $0x40] sm:$0xff]  ;;  %v62_v32 = vld [vmem:[%s482_s1 + $0x138] sm:$0xff] }
   0xb   :  { %117 = vmatpush.msra.mxu1 %v51_v15  ;;  %95 = vmatpush.msra.mxu0 %v34_v17  ;;  %v48_v27 = vld [vmem:[%s482_s1 + $0xc8] sm:$0xff]  ;;  %v79_v30 = vld [vmem:[%s482_s1 + $0x1c0] sm:$0xff]  ;;  %v30_v33 = vld [vmem:[%s482_s1 + $0x38] sm:$0xff] }
   0xc   :  { %164 = vmatpush.msra.mxu3 %v82_v18  ;;  %142 = vmatpush.msra.mxu2 %v65_v20  ;;  %v47_v31 = vld [vmem:[%s482_s1 + $0xc0] sm:$0xff]  ;;  %v78_v34 = vld [vmem:[%s482_s1 + $0x1b8] sm:$0xff]  ;;  %v61_v36 = vld [vmem:[%s482_s1 + $0x130] sm:$0xff] }
   0xd   :  { %118 = vmatpush.msra.mxu1 %v50_v19  ;;  %96 = vmatpush.msra.mxu0 %v33_v21  ;;  %v46_v35 = vld [vmem:[%s482_s1 + $0xb8] sm:$0xff]  ;;  %v29_v37 = vld [vmem:[%s482_s1 + $0x30] sm:$0xff]  ;;  %v60_v40 = vld [vmem:[%s482_s1 + $0x128] sm:$0xff] }
   0xe   :  { %165 = vmatpush.msra.mxu3 %v81_v22  ;;  %143 = vmatpush.msra.mxu2 %v64_v24  ;;  %v77_v38 = vld [vmem:[%s482_s1 + $0x1b0] sm:$0xff]  ;;  %v28_v41 = vld [vmem:[%s482_s1 + $0x28] sm:$0xff]  ;;  %v59_v44 = vld [vmem:[%s482_s1 + $0x120] sm:$0xff] }
   0xf   :  { %119 = vmatpush.msra.mxu1 %v49_v23  ;;  %97 = vmatpush.msra.mxu0 %v32_v25  ;;  %v45_v39 = vld [vmem:[%s482_s1 + $0xb0] sm:$0xff]  ;;  %v76_v42 = vld [vmem:[%s482_s1 + $0x1a8] sm:$0xff]  ;;  %v27_v45 = vld [vmem:[%s482_s1 + $0x20] sm:$0xff] }
  0x10   :  { %166 = vmatpush.msra.mxu3 %v80_v26  ;;  %144 = vmatpush.msra.mxu2 %v63_v28  ;;  %v44_v43 = vld [vmem:[%s482_s1 + $0xa8] sm:$0xff]  ;;  %v75_v46 = vld [vmem:[%s482_s1 + $0x1a0] sm:$0xff]  ;;  %v58_v48 = vld [vmem:[%s482_s1 + $0x118] sm:$0xff] }
  0x11   :  { %120 = vmatpush.msra.mxu1 %v48_v27  ;;  %98 = vmatpush.msra.mxu0 %v31_v29  ;;  %v43_v47 = vld [vmem:[%s482_s1 + $0xa0] sm:$0xff]  ;;  %v26_v49 = vld [vmem:[%s482_s1 + $0x18] sm:$0xff]  ;;  %v57_v50 = vld [vmem:[%s482_s1 + $0x110] sm:$0xff] }
  0x12   :  { %167 = vmatpush.msra.mxu3 %v79_v30  ;;  %145 = vmatpush.msra.mxu2 %v62_v32  ;;  %v74_v51 = vld [vmem:[%s482_s1 + $0x198] sm:$0xff]  ;;  %v25_v53 = vld [vmem:[%s482_s1 + $0x10] sm:$0xff] }
  0x13   :  { %121 = vmatpush.msra.mxu1 %v47_v31  ;;  %99 = vmatpush.msra.mxu0 %v30_v33  ;;  %v42_v52 = vld [vmem:[%s482_s1 + $0x98] sm:$0xff] }
  0x14   :  { %168 = vmatpush.msra.mxu3 %v78_v34  ;;  %146 = vmatpush.msra.mxu2 %v61_v36 }
  0x15   :  { %122 = vmatpush.msra.mxu1 %v46_v35  ;;  %100 = vmatpush.msra.mxu0 %v29_v37 }
  0x16   :  { %169 = vmatpush.msra.mxu3 %v77_v38  ;;  %147 = vmatpush.msra.mxu2 %v60_v40 }
  0x17   :  { %123 = vmatpush.msra.mxu1 %v45_v39  ;;  %101 = vmatpush.msra.mxu0 %v28_v41 }
  0x18   :  { %170 = vmatpush.msra.mxu3 %v76_v42  ;;  %148 = vmatpush.msra.mxu2 %v59_v44 }
  0x19   :  { %124 = vmatpush.msra.mxu1 %v44_v43  ;;  %102 = vmatpush.msra.mxu0 %v27_v45 }
  0x1a   :  { %171 = vmatpush.msra.mxu3 %v75_v46 }
  0x1b   :  { %125 = vmatpush.msra.mxu1 %v43_v47 }
  0x1c   :  { %8 = vsyncpa [#allocation3], 0  ;;  %149 = vmatpush.msra.mxu2 %v58_v48  ;;  %103 = vmatpush.msra.mxu0 %v26_v49  ;;  %v73_v54 = vld [vmem:[%s482_s1 + $0x190] sm:$0xff]  ;;  %v56_v56 = vld [vmem:[%s482_s1 + $0x108] sm:$0xff]  ;;  %vm183_vm0 = vcmask 261120   ;;  %s235_s25 = smov 128  }
  0x1d   :  { %v41_v55 = vld [vmem:[%s482_s1 + $0x90] sm:$0xff]  ;;  %172 = vmatpush.msra.mxu3 %v74_v51  ;;  %126 = vmatpush.msra.mxu1 %v42_v52  ;;  %v24_v57 = vld [vmem:[%s482_s1 + $0x8] sm:$0xff]  ;;  %v55_v60 = vld [vmem:[%s482_s1 + $0x100] sm:$0xff]  ;;  %s236_s26 = smov 8  }
  0x1e   :  { %150 = vmatpush.msra.mxu2 %v57_v50  ;;  %104 = vmatpush.msra.mxu0 %v25_v53  ;;  %v72_v58 = vld [vmem:[%s482_s1 + $0x188] sm:$0xff]  ;;  %v23_v61 = vld [vmem:[%s482_s1] sm:$0xff]  ;;  %v17_v62 = vld [vmem:[%s481_s0 + $0x10] sm:$0xff] }
  0x1f   :  { %v40_v59 = vld [vmem:[%s482_s1 + $0x88] sm:$0xff]  ;;  %173 = vmatpush.msra.mxu3 %v73_v54  ;;  %127 = vmatpush.msra.mxu1 %v41_v55  ;;  %v71_v63 = vld [vmem:[%s482_s1 + $0x180] sm:$0xff]  ;;  %v18_v1 = vld [vmem:[%s481_s0 + $0x18] sm:$0xff] }
  0x20   :  { %151 = vmatpush.msra.mxu2 %v56_v56  ;;  %105 = vmatpush.msra.mxu0 %v24_v57  ;;  %v15_v0 = vld [vmem:[%s481_s0] sm:$0xff]  ;;  %v16_v3 = vld [vmem:[%s481_s0 + $0x8] sm:$0xff]  ;;  %v21_v4 = vld [vmem:[%s481_s0 + $0x30] sm:$0xff] }
  0x21   :  { %174 = vmatpush.msra.mxu3 %v72_v58  ;;  %128 = vmatpush.msra.mxu1 %v40_v59  ;;  %v39_v2 = vld [vmem:[%s482_s1 + $0x80] sm:$0xff]  ;;  %v22_v6 = vld [vmem:[%s481_s0 + $0x38] sm:$0xff]  ;;  %v20_v7 = vld [vmem:[%s481_s0 + $0x28] sm:$0xff] }
  0x22   :  { %152 = vmatpush.msra.mxu2 %v55_v60  ;;  %106 = vmatpush.msra.mxu0 %v23_v61  ;;  %v19_v5 = vld [vmem:[%s481_s0 + $0x20] sm:$0xff]  ;;  %s234_s0 = smov [#allocation2]  }
  0x23   :  { %153 = vmatmul.f32.vlgmr.msra.gmra.mxu2 %v17_v62  ;;  %175 = vmatpush.msra.mxu3 %v71_v63  ;;  %v207_v8 = vld [vmem:[%s483_s2] ss:$0 sm:$0xff]  ;;  %s190_s22 = sshll.u32 %s234_s0, 4  ;;  %s192_s2 = sshll.u32 %s484_s3, 4  ;;  %s191_s22 = int_to_ptr.vmem [resolvable:$true] %s190_s22  ;;  %s193_s2 = int_to_ptr.hbm [resolvable:$true] %s192_s2 }
  0x24   :  { %107 = vmatmul.f32.vlgmr.msra.gmra.mxu0 %v15_v0  ;;  %176 = vmatmul.f32.vlgmr.msra.gmra.mxu3 %v18_v1 }
  0x25   :  { %129 = vmatpush.msra.mxu1 %v39_v2 }
  0x26   :  { %130 = vmatmul.f32.vlgmr.msra.gmra.mxu1 %v16_v3 }
  0x2b   :  { %156 = vmatmul.f32.gmra.mxu2 %v21_v4 }
  0x2c   :  { %110 = vmatmul.f32.gmra.mxu0 %v19_v5  ;;  %179 = vmatmul.f32.gmra.mxu3 %v22_v6 }
  0x2e   :  { %133 = vmatmul.f32.gmra.mxu1 %v20_v7 }
  0xa1   :  { %v108_v9 = vpop.f32.mrf.mxu0 }
  0xa2   :  { %v109_v10 = vadd.f32 %v207_v8, %v108_v9 }
  0xa3   :  { %v131_v11 = vpop.f32.mrf.mxu1 }
  0xa4   :  { %v132_v12 = vadd.f32 %v131_v11, %v109_v10 }
  0xa6   :  { %v154_v13 = vpop.f32.mrf.mxu2 }
  0xa7   :  { %v155_v14 = vadd.f32 %v154_v13, %v132_v12  ;;  %v177_v15 = vpop.f32.mrf.mxu3 }
  0xa9   :  { %v178_v16 = vadd.f32 %v177_v15, %v155_v14  ;;  %v111_v17 = vpop.f32.mrf.mxu0 }
  0xaa   :  { %v112_v18 = vadd.f32 %v207_v8, %v111_v17 }
  0xab   :  { %184 = vst.msk [vmem:[#allocation2] sm:$0xff] %vm183_vm0, %v178_v16  ;;  %v134_v19 = vpop.f32.mrf.mxu1 }
  0xac   :  { %v135_v20 = vadd.f32 %v134_v19, %v112_v18 }
  0xae   :  { %v157_v21 = vpop.f32.mrf.mxu2 }
  0xaf   :  { %v158_v22 = vadd.f32 %v157_v21, %v135_v20  ;;  %v180_v23 = vpop.f32.mrf.mxu3 }
  0xb1   :  { %v181_v24 = vadd.f32 %v180_v23, %v158_v22 }
  0xb3   :  { %185 = vst.msk [vmem:[#allocation2 + $0x8] sm:$0xff] %vm183_vm0, %v181_v24 }
  0xb4   :  { %198 = dma.vmem_to_hbm [thread:$0]  %s191_s22, 256, %s193_s2, [#allocation3], %s235_s25, %s235_s25, %s236_s26  }
  0xb5   :  { %232 = dma.done.wait [#allocation3], 256  }
  0xb6   :  { %233 = vsyncadd [#allocation3], 4294967040 }
  0xb7   :  { %203 = vsyncpa [#allocation3], 1 }

// kernel: attention_forward.4
= control target key start
LH: loop header
LB: loop body
LE: loop exit
PB: predicated region body
PF: predicated region fallthrough
CT: control target
= control target key end

     0   :  { %vm51_vm0 = vcmask 523264   ;;  %vm565_vm1 = vcmask 64512   ;;  %vm18_vm2 = vcmask 7168   ;;  %v1972_v48 = vmov -inf   ;;  %s2654_s1 = inlined_call_operand.vmem [shape: f32[16,8,64], index: 1, kind: input, shape index: {}]   ;;  %s2655_s0 = inlined_call_operand.vmem [shape: f32[16,8,64], index: 0, kind: input, shape index: {}]   ;;  %s2656_s2 = inlined_call_operand.vmem [shape: f32[16,8,64], index: 2, kind: input, shape index: {}]   ;;  %s2657_s3 = inlined_call_operand.vmem [shape: f32[16,8,64], index: 3, kind: output, shape index: {}]  }
   0x1   :  { %v84_v0 = vld [vmem:[%s2654_s1] sm:$0xff]  ;;  %v86_v1 = vld [vmem:[%s2654_s1 + $0x10] sm:$0xff]  ;;  %v85_v5 = vld [vmem:[%s2654_s1 + $0x8] sm:$0xff]  ;;  %19 = vst.msk [vmem:[#allocation2] sm:$0xff] %vm18_vm2, %v1972_v48 }
   0x2   :  { %v68_v2 = vld [vmem:[%s2655_s0] sm:$0xff]  ;;  %1822 = vmatpush.xpose.msk.msra.mxu0 %vm51_vm0, %v84_v0  ;;  %1826 = vmatpush.xpose.msk.msra.mxu2 %vm51_vm0, %v86_v1  ;;  %v70_v3 = vld [vmem:[%s2655_s0 + $0x10] sm:$0xff]  ;;  %v87_v6 = vld [vmem:[%s2654_s1 + $0x18] sm:$0xff]  ;;  %20 = vst.msk [vmem:[#allocation2 + $0x8] sm:$0xff] %vm18_vm2, %v1972_v48 }
   0x3   :  { %v88_v4 = vld [vmem:[%s2654_s1 + $0x20] sm:$0xff]  ;;  %1824 = vmatpush.xpose.msk.msra.mxu1 %vm51_vm0, %v85_v5  ;;  %v90_v7 = vld [vmem:[%s2654_s1 + $0x30] sm:$0xff]  ;;  %v69_v8 = vld [vmem:[%s2655_s0 + $0x8] sm:$0xff]  ;;  %1828 = vmatpush.xpose.msk.msra.mxu3 %vm51_vm0, %v87_v6  ;;  %21 = vst.msk [vmem:[#allocation2 + $0x10] sm:$0xff] %vm18_vm2, %v1972_v48 }
   0x4   :  { %v71_v9 = vld [vmem:[%s2655_s0 + $0x18] sm:$0xff]  ;;  %v89_v10 = vld [vmem:[%s2654_s1 + $0x28] sm:$0xff]  ;;  %v92_v12 = vld [vmem:[%s2654_s1 + $0x40] sm:$0xff]  ;;  %22 = vst.msk [vmem:[#allocation2 + $0x18] sm:$0xff] %vm18_vm2, %v1972_v48 }
   0x5   :  { %1823 = vmatmul.msk.f32.vlgmr.msra.gmra.mxu0 %vm51_vm0, %v68_v2  ;;  %1827 = vmatmul.msk.f32.vlgmr.msra.gmra.mxu2 %vm51_vm0, %v70_v3  ;;  %v93_v11 = vld [vmem:[%s2654_s1 + $0x48] sm:$0xff]  ;;  %v91_v13 = vld [vmem:[%s2654_s1 + $0x38] sm:$0xff]  ;;  %v94_v15 = vld [vmem:[%s2654_s1 + $0x50] sm:$0xff]  ;;  %23 = vst.msk [vmem:[#allocation2 + $0x20] sm:$0xff] %vm18_vm2, %v1972_v48 }
   0x6   :  { %1830 = vmatpush.xpose.msk.msrb.mxu0 %vm51_vm0, %v88_v4  ;;  %1834 = vmatpush.xpose.msk.msrb.mxu2 %vm51_vm0, %v90_v7  ;;  %v95_v14 = vld [vmem:[%s2654_s1 + $0x58] sm:$0xff]  ;;  %v72_v16 = vld [vmem:[%s2655_s0 + $0x20] sm:$0xff]  ;;  %v74_v17 = vld [vmem:[%s2655_s0 + $0x30] sm:$0xff]  ;;  %24 = vst.msk [vmem:[#allocation2 + $0x28] sm:$0xff] %vm18_vm2, %v1972_v48 }
   0x7   :  { %1825 = vmatmul.msk.f32.vlgmr.msra.gmra.mxu1 %vm51_vm0, %v69_v8  ;;  %1829 = vmatmul.msk.f32.vlgmr.msra.gmra.mxu3 %vm51_vm0, %v71_v9  ;;  %v73_v18 = vld [vmem:[%s2655_s0 + $0x28] sm:$0xff]  ;;  %v96_v19 = vld [vmem:[%s2654_s1 + $0x60] sm:$0xff]  ;;  %v75_v20 = vld [vmem:[%s2655_s0 + $0x38] sm:$0xff]  ;;  %25 = vst.msk [vmem:[#allocation2 + $0x30] sm:$0xff] %vm18_vm2, %v1972_v48 }
   0x8   :  { %1832 = vmatpush.xpose.msk.msrb.mxu1 %vm51_vm0, %v89_v10  ;;  %1836 = vmatpush.xpose.msk.msrb.mxu3 %vm51_vm0, %v91_v13  ;;  %v98_v21 = vld [vmem:[%s2654_s1 + $0x70] sm:$0xff]  ;;  %v99_v22 = vld [vmem:[%s2654_s1 + $0x78] sm:$0xff]  ;;  %v97_v23 = vld [vmem:[%s2654_s1 + $0x68] sm:$0xff]  ;;  %26 = vst.msk [vmem:[#allocation2 + $0x38] sm:$0xff] %vm18_vm2, %v1972_v48 }
   0x9   :  { %v76_v24 = vld [vmem:[%s2655_s0 + $0x40] sm:$0xff]  ;;  %v78_v25 = vld [vmem:[%s2655_s0 + $0x50] sm:$0xff]  ;;  %v77_v26 = vld [vmem:[%s2655_s0 + $0x48] sm:$0xff]  ;;  %27 = vst.msk [vmem:[#allocation2 + $0x40] sm:$0xff] %vm18_vm2, %v1972_v48 }
   0xa   :  { %1838 = vmatpush.xpose.msk.msra.mxu0 %vm51_vm0, %v92_v12  ;;  %1842 = vmatpush.xpose.msk.msra.mxu2 %vm51_vm0, %v94_v15  ;;  %v79_v27 = vld [vmem:[%s2655_s0 + $0x58] sm:$0xff]  ;;  %v80_v28 = vld [vmem:[%s2655_s0 + $0x60] sm:$0xff]  ;;  %v82_v29 = vld [vmem:[%s2655_s0 + $0x70] sm:$0xff]  ;;  %28 = vst.msk [vmem:[#allocation2 + $0x48] sm:$0xff] %vm18_vm2, %v1972_v48 }
   0xb   :  { %v81_v30 = vld [vmem:[%s2655_s0 + $0x68] sm:$0xff]  ;;  %v83_v31 = vld [vmem:[%s2655_s0 + $0x78] sm:$0xff]  ;;  %29 = vst.msk [vmem:[#allocation2 + $0x50] sm:$0xff] %vm18_vm2, %v1972_v48 }
   0xc   :  { %1840 = vmatpush.xpose.msk.msra.mxu1 %vm51_vm0, %v93_v11  ;;  %1844 = vmatpush.xpose.msk.msra.mxu3 %vm51_vm0, %v95_v14  ;;  %30 = vst.msk [vmem:[#allocation2 + $0x58] sm:$0xff] %vm18_vm2, %v1972_v48 }
   0xd   :  { %1831 = vmatmul.msk.f32.vlgmr.msrb.gmra.mxu0 %vm51_vm0, %v72_v16  ;;  %1835 = vmatmul.msk.f32.vlgmr.msrb.gmra.mxu2 %vm51_vm0, %v74_v17  ;;  %31 = vst.msk [vmem:[#allocation2 + $0x60] sm:$0xff] %vm18_vm2, %v1972_v48  ;;  %v1973_v17 = vmov 0  }
   0xe   :  { %1846 = vmatpush.xpose.msk.msrb.mxu0 %vm51_vm0, %v96_v19  ;;  %1850 = vmatpush.xpose.msk.msrb.mxu2 %vm51_vm0, %v98_v21  ;;  %32 = vst.msk [vmem:[#allocation2 + $0x68] sm:$0xff] %vm18_vm2, %v1972_v48  ;;  %v549_v19 = vld [vmem:[#allocation2] sm:$0xff] }
   0xf   :  { %1833 = vmatmul.msk.f32.vlgmr.msrb.gmra.mxu1 %vm51_vm0, %v73_v18  ;;  %1837 = vmatmul.msk.f32.vlgmr.msrb.gmra.mxu3 %vm51_vm0, %v75_v20  ;;  %33 = vst.msk [vmem:[#allocation2 + $0x70] sm:$0xff] %vm18_vm2, %v1972_v48  ;;  %v1974_v18 = vmov 0.0  }
  0x10   :  { %1852 = vmatpush.xpose.msk.msrb.mxu3 %vm51_vm0, %v99_v22  ;;  %1848 = vmatpush.xpose.msk.msrb.mxu1 %vm51_vm0, %v97_v23  ;;  %34 = vst.msk [vmem:[#allocation2 + $0x78] sm:$0xff] %vm18_vm2, %v1972_v48  ;;  %v551_v23 = vld [vmem:[#allocation2 + $0x10] sm:$0xff] }
  0x11   :  { %1873 = vset.pattern.permute.xlu1 %v1973_v17  ;;  %1875 = vset.pattern.permute.xlu0 %v1973_v17  ;;  %53 = vst.msk [vmem:[#allocation4 + $0x8] sm:$0xff] %vm51_vm0, %v1974_v18 }
  0x12   :  { %1874 = vset.pattern.permute.xlu2 %v1973_v17  ;;  %35 = vst.msk [vmem:[#allocation3] sm:$0xff] %vm18_vm2, %v1974_v18 }
  0x13   :  { %36 = vst.msk [vmem:[#allocation3 + $0x8] sm:$0xff] %vm18_vm2, %v1974_v18 }
  0x14   :  { %37 = vst.msk [vmem:[#allocation3 + $0x10] sm:$0xff] %vm18_vm2, %v1974_v18 }
  0x15   :  { %1839 = vmatmul.msk.f32.vlgmr.msra.gmra.mxu0 %vm51_vm0, %v76_v24  ;;  %1843 = vmatmul.msk.f32.vlgmr.msra.gmra.mxu2 %vm51_vm0, %v78_v25  ;;  %38 = vst.msk [vmem:[#allocation3 + $0x18] sm:$0xff] %vm18_vm2, %v1974_v18  ;;  %v550_v25 = vld [vmem:[#allocation2 + $0x8] sm:$0xff] }
  0x16   :  { %39 = vst.msk [vmem:[#allocation3 + $0x20] sm:$0xff] %vm18_vm2, %v1974_v18 }
  0x17   :  { %1841 = vmatmul.msk.f32.vlgmr.msra.gmra.mxu1 %vm51_vm0, %v77_v26  ;;  %1845 = vmatmul.msk.f32.vlgmr.msra.gmra.mxu3 %vm51_vm0, %v79_v27  ;;  %40 = vst.msk [vmem:[#allocation3 + $0x28] sm:$0xff] %vm18_vm2, %v1974_v18  ;;  %v553_v26 = vld [vmem:[#allocation2 + $0x20] sm:$0xff] }
  0x18   :  { %41 = vst.msk [vmem:[#allocation3 + $0x30] sm:$0xff] %vm18_vm2, %v1974_v18 }
  0x19   :  { %42 = vst.msk [vmem:[#allocation3 + $0x38] sm:$0xff] %vm18_vm2, %v1974_v18 }
  0x1a   :  { %43 = vst.msk [vmem:[#allocation3 + $0x40] sm:$0xff] %vm18_vm2, %v1974_v18 }
  0x1b   :  { %44 = vst.msk [vmem:[#allocation3 + $0x48] sm:$0xff] %vm18_vm2, %v1974_v18 }
  0x1c   :  { %45 = vst.msk [vmem:[#allocation3 + $0x50] sm:$0xff] %vm18_vm2, %v1974_v18 }
  0x1d   :  { %1847 = vmatmul.msk.f32.vlgmr.msrb.gmra.mxu0 %vm51_vm0, %v80_v28  ;;  %1851 = vmatmul.msk.f32.vlgmr.msrb.gmra.mxu2 %vm51_vm0, %v82_v29  ;;  %46 = vst.msk [vmem:[#allocation3 + $0x58] sm:$0xff] %vm18_vm2, %v1974_v18 }
  0x1e   :  { %47 = vst.msk [vmem:[#allocation3 + $0x60] sm:$0xff] %vm18_vm2, %v1974_v18 }
  0x1f   :  { %1849 = vmatmul.msk.f32.vlgmr.msrb.gmra.mxu1 %vm51_vm0, %v81_v30  ;;  %1853 = vmatmul.msk.f32.vlgmr.msrb.gmra.mxu3 %vm51_vm0, %v83_v31  ;;  %48 = vst.msk [vmem:[#allocation3 + $0x68] sm:$0xff] %vm18_vm2, %v1974_v18 }
  0x20   :  { %49 = vst.msk [vmem:[#allocation3 + $0x70] sm:$0xff] %vm18_vm2, %v1974_v18 }
  0x21   :  { %50 = vst.msk [vmem:[#allocation3 + $0x78] sm:$0xff] %vm18_vm2, %v1974_v18 }
  0x22   :  { %52 = vst.msk [vmem:[#allocation4] sm:$0xff] %vm51_vm0, %v1974_v18 }
  0x23   :  { %54 = vst.msk [vmem:[#allocation4 + $0x10] sm:$0xff] %vm51_vm0, %v1974_v18 }
  0x24   :  { %55 = vst.msk [vmem:[#allocation4 + $0x18] sm:$0xff] %vm51_vm0, %v1974_v18 }
  0x25   :  { %56 = vst.msk [vmem:[#allocation4 + $0x20] sm:$0xff] %vm51_vm0, %v1974_v18 }
  0x26   :  { %57 = vst.msk [vmem:[#allocation4 + $0x28] sm:$0xff] %vm51_vm0, %v1974_v18 }
  0x27   :  { %58 = vst.msk [vmem:[#allocation4 + $0x30] sm:$0xff] %vm51_vm0, %v1974_v18 }
  0x28   :  { %59 = vst.msk [vmem:[#allocation4 + $0x38] sm:$0xff] %vm51_vm0, %v1974_v18 }
  0x29   :  { %60 = vst.msk [vmem:[#allocation4 + $0x40] sm:$0xff] %vm51_vm0, %v1974_v18 }
  0x2a   :  { %61 = vst.msk [vmem:[#allocation4 + $0x48] sm:$0xff] %vm51_vm0, %v1974_v18 }
  0x2b   :  { %62 = vst.msk [vmem:[#allocation4 + $0x50] sm:$0xff] %vm51_vm0, %v1974_v18 }
  0x2c   :  { %63 = vst.msk [vmem:[#allocation4 + $0x58] sm:$0xff] %vm51_vm0, %v1974_v18 }
  0x2d   :  { %64 = vst.msk [vmem:[#allocation4 + $0x60] sm:$0xff] %vm51_vm0, %v1974_v18 }
  0x2e   :  { %65 = vst.msk [vmem:[#allocation4 + $0x68] sm:$0xff] %vm51_vm0, %v1974_v18 }
  0x2f   :  { %66 = vst.msk [vmem:[#allocation4 + $0x70] sm:$0xff] %vm51_vm0, %v1974_v18 }
  0x30   :  { %67 = vst.msk [vmem:[#allocation4 + $0x78] sm:$0xff] %vm51_vm0, %v1974_v18 }
  0x82   :  { %v140_v32 = vpop.f32.mrf.mxu0 }
  0x83   :  { %v2123_v33 = vmul.f32 0.125, %v140_v32 }
  0x84   :  { %v166_v34 = vpop.f32.mrf.mxu1 }
  0x85   :  { %v566_v35 = vsel %vm565_vm1, %v2123_v33, -inf  ;;  %v2127_v36 = vmul.f32 0.125, %v166_v34  ;;  %v552_v34 = vld [vmem:[#allocation2 + $0x18] sm:$0xff] }
  0x86   :  { %567 = vmax.xlane.f32.xlu0 %v566_v35 }
  0x87   :  { %v569_v43 = vsel %vm565_vm1, %v2127_v36, -inf }
  0x88   :  { %v192_v37 = vpop.f32.mrf.mxu2 }
  0x89   :  { %v2129_v38 = vmul.f32 0.125, %v192_v37  ;;  %v2239_v37 = vld [vmem:[#allocation2 + $0x30] sm:$0xff] }
  0x8a   :  { %v244_v39 = vpop.f32.mrf.mxu0  ;;  %v218_v40 = vpop.f32.mrf.mxu3 }
  0x8b   :  { %v2131_v41 = vmul.f32 0.125, %v244_v39  ;;  %v572_v42 = vsel %vm565_vm1, %v2129_v38, -inf  ;;  %v2139_v46 = vmul.f32 0.125, %v218_v40  ;;  %v2241_v39 = vld [vmem:[#allocation2 + $0x28] sm:$0xff] }
  0x8c   :  { %v270_v44 = vpop.f32.mrf.mxu1  ;;  %573 = vmax.xlane.f32.xlu1 %v572_v42 }
  0x8d   :  { %v578_v45 = vsel %vm565_vm1, %v2131_v41, -inf  ;;  %v2141_v47 = vmul.f32 0.125, %v270_v44  ;;  %v575_v51 = vsel %vm565_vm1, %v2139_v46, -inf }
  0x8e   :  { %570 = vmax.xlane.f32.xlu0 %v569_v43  ;;  %579 = vmax.xlane.f32.xlu2 %v578_v45 }
  0x8f   :  { %v581_v54 = vsel %vm565_vm1, %v2141_v47, -inf }
  0x90   :  { %v296_v49 = vpop.f32.mrf.mxu2 }
  0x91   :  { %v2145_v50 = vmul.f32 0.125, %v296_v49 }
  0x92   :  { %v322_v52 = vpop.f32.mrf.mxu3  ;;  %v348_v56 = vpop.f32.mrf.mxu0 }
  0x93   :  { %v584_v53 = vsel %vm565_vm1, %v2145_v50, -inf  ;;  %v2157_v57 = vmul.f32 0.125, %v322_v52  ;;  %v2163_v59 = vmul.f32 0.125, %v348_v56 }
  0x94   :  { %576 = vmax.xlane.f32.xlu1 %v575_v51  ;;  %v374_v55 = vpop.f32.mrf.mxu1  ;;  %v2254_v51 = vld [vmem:[#allocation2 + $0x38] sm:$0xff] }
  0x95   :  { %v2161_v58 = vmul.f32 0.125, %v374_v55  ;;  %v587_v60 = vsel %vm565_vm1, %v2157_v57, -inf  ;;  %v590_v63 = vsel %vm565_vm1, %v2163_v59, -inf }
  0x96   :  { %585 = vmax.xlane.f32.xlu0 %v584_v53  ;;  %582 = vmax.xlane.f32.xlu2 %v581_v54  ;;  %v2256_v53 = vld [vmem:[#allocation2 + $0x48] sm:$0xff]  ;;  %v2258_v54 = vld [vmem:[#allocation2 + $0x40] sm:$0xff] }
  0x97   :  { %v593_v62 = vsel %vm565_vm1, %v2161_v58, -inf }
  0x98   :  { %v400_v61 = vpop.f32.mrf.mxu2 }
  0x99   :  { %v2177_v2 = vmul.f32 0.125, %v400_v61 }
  0x9a   :  { %v426_v0 = vpop.f32.mrf.mxu3  ;;  %v452_v1 = vpop.f32.mrf.mxu0 }
  0x9b   :  { %v2181_v3 = vmul.f32 0.125, %v426_v0  ;;  %v2183_v4 = vmul.f32 0.125, %v452_v1  ;;  %v596_v5 = vsel %vm565_vm1, %v2177_v2, -inf }
  0x9c   :  { %588 = vmax.xlane.f32.xlu1 %v587_v60  ;;  %v478_v6 = vpop.f32.mrf.mxu1 }
  0x9d   :  { %v599_v7 = vsel %vm565_vm1, %v2181_v3, -inf  ;;  %v602_v8 = vsel %vm565_vm1, %v2183_v4, -inf  ;;  %v2191_v11 = vmul.f32 0.125, %v478_v6  ;;  %v2274_v6 = vld [vmem:[#allocation2 + $0x50] sm:$0xff] }
  0x9e   :  { %594 = vmax.xlane.f32.xlu0 %v593_v62  ;;  %591 = vmax.xlane.f32.xlu2 %v590_v63 }
  0x9f   :  { %v605_v14 = vsel %vm565_vm1, %v2191_v11, -inf }
  0xa0   :  { %v504_v10 = vpop.f32.mrf.mxu2 }
  0xa1   :  { %v2195_v13 = vmul.f32 0.125, %v504_v10 }
  0xa2   :  { %v530_v9 = vpop.f32.mrf.mxu3 }
  0xa3   :  { %v2193_v12 = vmul.f32 0.125, %v530_v9  ;;  %v608_v16 = vsel %vm565_vm1, %v2195_v13, -inf  ;;  %v2276_v9 = vld [vmem:[#allocation2 + $0x58] sm:$0xff] }
  0xa4   :  { %597 = vmax.xlane.f32.xlu1 %v596_v5 }
  0xa5   :  { %v611_v15 = vsel %vm565_vm1, %v2193_v12, -inf }
  0xa6   :  { %600 = vmax.xlane.f32.xlu2 %v599_v7  ;;  %603 = vmax.xlane.f32.xlu0 %v602_v8 }
  0xac   :  { %606 = vmax.xlane.f32.xlu1 %v605_v14  ;;  %v2278_v14 = vld [vmem:[#allocation2 + $0x60] sm:$0xff] }
  0xae   :  { %612 = vmax.xlane.f32.xlu0 %v611_v15  ;;  %609 = vmax.xlane.f32.xlu2 %v608_v16 }
  0xf9   :  { %v568_v20 = vpop.xlane.xlu0 %567 }
  0xfa   :  { %v614_v21 = vmax.f32 %v549_v19, %v568_v20 }
  0xfc   :  { %1431 = vst.msk [vmem:[#allocation2] sm:$0xff] %vm18_vm2, %v614_v21  ;;  %680 = vperm.xlu1 %1873, %v614_v21   ;;  %v630_v22 = vsub.f32 %v549_v19, %v614_v21 }
  0xfe   :  { %v646_v28 = vmul.f32 1.442695, %v630_v22 }
  0xff   :  { %v574_v24 = vpop.xlane.xlu1 %573 }
 0x100   :  { %v616_v27 = vmax.f32 %v551_v23, %v574_v24  ;;  %1876 = vpow2.f32 %v646_v28  ;;  %v562_v24 = vld [vmem:[#allocation2 + $0x68] sm:$0xff] }
 0x101   :  { %v571_v29 = vpop.xlane.xlu0 %570  ;;  %v580_v30 = vpop.xlane.xlu2 %579 }
 0x102   :  { %1433 = vst.msk [vmem:[#allocation2 + $0x10] sm:$0xff] %vm18_vm2, %v616_v27  ;;  %v615_v31 = vmax.f32 %v550_v25, %v571_v29  ;;  %v618_v32 = vmax.f32 %v553_v26, %v580_v30  ;;  %690 = vperm.xlu0 %1875, %v616_v27   ;;  %v632_v52 = vsub.f32 %v551_v23, %v616_v27  ;;  %v2297_v27 = vld [vmem:[#allocation2 + $0x70] sm:$0xff] }
 0x104   :  { %1432 = vst.msk [vmem:[#allocation2 + $0x8] sm:$0xff] %vm18_vm2, %v615_v31  ;;  %700 = vperm.xlu1 %1873, %v618_v32   ;;  %685 = vperm.xlu2 %1874, %v615_v31   ;;  %v631_v49 = vsub.f32 %v550_v25, %v615_v31  ;;  %v650_v63 = vmul.f32 1.442695, %v632_v52  ;;  %v634_v7 = vsub.f32 %v553_v26, %v618_v32  ;;  %v564_v26 = vld [vmem:[#allocation2 + $0x78] sm:$0xff] }
 0x105   :  { %1435 = vst.msk [vmem:[#allocation2 + $0x20] sm:$0xff] %vm18_vm2, %v618_v32 }
 0x106   :  { %v2248_v48 = vpop.eup %1876  ;;  %v648_v60 = vmul.f32 1.442695, %v631_v49  ;;  %v654_v18 = vmul.f32 1.442695, %v634_v7 }
 0x107   :  { %v577_v35 = vpop.xlane.xlu1 %576 }
 0x108   :  { %v617_v40 = vmax.f32 %v552_v34, %v577_v35  ;;  %1878 = vpow2.f32 %v648_v60 }
 0x109   :  { %v586_v42 = vpop.xlane.xlu0 %585  ;;  %v583_v43 = vpop.xlane.xlu2 %582  ;;  %1880 = vpow2.f32 %v650_v63 }
 0x10a   :  { %1434 = vst.msk [vmem:[#allocation2 + $0x18] sm:$0xff] %vm18_vm2, %v617_v40  ;;  %v2245_v44 = vmax.f32 %v2239_v37, %v586_v42  ;;  %v619_v45 = vmax.f32 %v2241_v39, %v583_v43  ;;  %v633_v5 = vsub.f32 %v552_v34, %v617_v40 }
 0x10c   :  { %1437 = vst.msk [vmem:[#allocation2 + $0x30] sm:$0xff] %vm18_vm2, %v2245_v44  ;;  %937 = vperm.xlu1 %1873, %v2248_v48   ;;  %695 = vperm.xlu2 %1874, %v617_v40   ;;  %v652_v8 = vmul.f32 1.442695, %v633_v5  ;;  %v635_v23 = vsub.f32 %v2241_v39, %v619_v45  ;;  %v636_v40 = vsub.f32 %v2239_v37, %v2245_v44 }
 0x10d   :  { %1436 = vst.msk [vmem:[#allocation2 + $0x28] sm:$0xff] %vm18_vm2, %v619_v45 }
 0x10e   :  { %v2285_v20 = vpop.eup %1878  ;;  %1882 = vpow2.f32 %v652_v8  ;;  %v656_v30 = vmul.f32 1.442695, %v635_v23  ;;  %v658_v43 = vmul.f32 1.442695, %v636_v40 }
 0x10f   :  { %v589_v55 = vpop.xlane.xlu1 %588  ;;  %v2288_v22 = vpop.eup %1880  ;;  %1884 = vpow2.f32 %v654_v18 }
 0x110   :  { %v621_v56 = vmax.f32 %v2254_v51, %v589_v55  ;;  %1886 = vpow2.f32 %v656_v30 }
 0x111   :  { %v595_v61 = vpop.xlane.xlu0 %594  ;;  %v592_v62 = vpop.xlane.xlu2 %591  ;;  %1888 = vpow2.f32 %v658_v43 }
 0x112   :  { %v2262_v0 = vmax.f32 %v2256_v53, %v595_v61  ;;  %v2265_v1 = vmax.f32 %v2258_v54, %v592_v62  ;;  %1438 = vst.msk [vmem:[#allocation2 + $0x38] sm:$0xff] %vm18_vm2, %v621_v56  ;;  %v637_v42 = vsub.f32 %v2254_v51, %v621_v56 }
 0x114   :  { %1440 = vst.msk [vmem:[#allocation2 + $0x48] sm:$0xff] %vm18_vm2, %v2262_v0  ;;  %710 = vperm.xlu1 %1873, %v2245_v44   ;;  %705 = vperm.xlu2 %1874, %v619_v45   ;;  %v2299_v29 = vpop.eup %1882  ;;  %v660_v45 = vmul.f32 1.442695, %v637_v42  ;;  %v639_v52 = vsub.f32 %v2256_v53, %v2262_v0 }
 0x115   :  { %725 = vperm.xlu0 %1875, %v2262_v0   ;;  %1439 = vst.msk [vmem:[#allocation2 + $0x40] sm:$0xff] %vm18_vm2, %v2265_v1  ;;  %v2303_v39 = vpop.eup %1884 }
 0x116   :  { %v2312_v49 = vpop.eup %1886  ;;  %1890 = vpow2.f32 %v660_v45  ;;  %v664_v37 = vmul.f32 1.442695, %v639_v52 }
 0x117   :  { %v598_v10 = vpop.xlane.xlu1 %597  ;;  %v2318_v44 = vpop.eup %1888 }
 0x118   :  { %v624_v15 = vmax.f32 %v2274_v6, %v598_v10  ;;  %1892 = vpow2.f32 %v664_v37 }
 0x119   :  { %v601_v16 = vpop.xlane.xlu2 %600  ;;  %v604_v17 = vpop.xlane.xlu0 %603 }
 0x11a   :  { %v2282_v19 = vmax.f32 %v2276_v9, %v601_v16  ;;  %1441 = vst.msk [vmem:[#allocation2 + $0x50] sm:$0xff] %vm18_vm2, %v624_v15  ;;  %v626_v21 = vmax.f32 %v2278_v14, %v604_v17  ;;  %v640_v51 = vsub.f32 %v2274_v6, %v624_v15  ;;  %v101_v16 = vld [vmem:[%s2656_s2 + $0x8] sm:$0xff] }
 0x11b   :  { %1072 = vmatpush.msra.mxu1 %v101_v16 }
 0x11c   :  { %942 = vperm.xlu2 %1874, %v2285_v20   ;;  %720 = vperm.xlu1 %1873, %v2265_v1   ;;  %1442 = vst.msk [vmem:[#allocation2 + $0x58] sm:$0xff] %vm18_vm2, %v2282_v19  ;;  %v2320_v55 = vpop.eup %1890  ;;  %v666_v60 = vmul.f32 1.442695, %v640_v51  ;;  %v641_v62 = vsub.f32 %v2276_v9, %v2282_v19  ;;  %v642_v0 = vsub.f32 %v2278_v14, %v626_v21 }
 0x11d   :  { %947 = vperm.xlu0 %1875, %v2288_v22   ;;  %1443 = vst.msk [vmem:[#allocation2 + $0x60] sm:$0xff] %vm18_vm2, %v626_v21 }
 0x11e   :  { %v2327_v61 = vpop.eup %1892  ;;  %1894 = vpow2.f32 %v666_v60  ;;  %v668_v5 = vmul.f32 1.442695, %v641_v62  ;;  %v109_v60 = vld [vmem:[%s2656_s2 + $0x48] sm:$0xff] }
 0x11f   :  { %v607_v25 = vpop.xlane.xlu1 %606 }
 0x120   :  { %v627_v28 = vmax.f32 %v562_v24, %v607_v25  ;;  %v105_v25 = vld [vmem:[%s2656_s2 + $0x28] sm:$0xff] }
 0x121   :  { %v613_v31 = vpop.xlane.xlu0 %612  ;;  %v610_v32 = vpop.xlane.xlu2 %609  ;;  %1164 = vmatpush.msrb.mxu1 %v105_v25 }
 0x122   :  { %1444 = vst.msk [vmem:[#allocation2 + $0x68] sm:$0xff] %vm18_vm2, %v627_v28  ;;  %v629_v34 = vmax.f32 %v564_v26, %v613_v31  ;;  %v628_v35 = vmax.f32 %v2297_v27, %v610_v32  ;;  %v643_v63 = vsub.f32 %v562_v24, %v627_v28  ;;  %v100_v24 = vld [vmem:[%s2656_s2] sm:$0xff] }
 0x123   :  { %1049 = vmatpush.msra.mxu0 %v100_v24  ;;  %v104_v31 = vld [vmem:[%s2656_s2 + $0x20] sm:$0xff] }
 0x124   :  { %715 = vperm.xlu2 %1874, %v621_v56   ;;  %952 = vperm.xlu1 %1873, %v2299_v29   ;;  %1446 = vst.msk [vmem:[#allocation2 + $0x78] sm:$0xff] %vm18_vm2, %v629_v34  ;;  %v638_v56 = vsub.f32 %v2258_v54, %v2265_v1  ;;  %v672_v54 = vmul.f32 1.442695, %v643_v63  ;;  %v670_v1 = vmul.f32 1.442695, %v642_v0  ;;  %v2333_v6 = vpop.eup %1894  ;;  %v645_v8 = vsub.f32 %v564_v26, %v629_v34 }
 0x125   :  { %957 = vperm.xlu0 %1875, %v2303_v39   ;;  %1445 = vst.msk [vmem:[#allocation2 + $0x70] sm:$0xff] %vm18_vm2, %v628_v35  ;;  %v644_v9 = vsub.f32 %v2297_v27, %v628_v35  ;;  %1141 = vmatpush.msrb.mxu0 %v104_v31 }
 0x126   :  { %v662_v53 = vmul.f32 1.442695, %v638_v56  ;;  %v676_v10 = vmul.f32 1.442695, %v645_v8 }
 0x128   :  { %1896 = vpow2.f32 %v662_v53 }
 0x129   :  { %1898 = vpow2.f32 %v668_v5 }
 0x12a   :  { %1900 = vpow2.f32 %v672_v54 }
 0x12b   :  { %1902 = vpow2.f32 %v670_v1  ;;  %v108_v1 = vld [vmem:[%s2656_s2 + $0x40] sm:$0xff] }
 0x12c   :  { %962 = vperm.xlu2 %1874, %v2312_v49   ;;  %735 = vperm.xlu1 %1873, %v2282_v19   ;;  %1904 = vpow2.f32 %v676_v10  ;;  %v103_v19 = vld [vmem:[%s2656_s2 + $0x18] sm:$0xff] }
 0x12d   :  { %740 = vperm.xlu0 %1875, %v626_v21   ;;  %1118 = vmatpush.msra.mxu3 %v103_v19 }
 0x12e   :  { %v2335_v7 = vpop.eup %1896 }
 0x12f   :  { %v2340_v14 = vpop.eup %1898 }
 0x130   :  { %v2345_v17 = vpop.eup %1900 }
 0x131   :  { %v2347_v18 = vpop.eup %1902 }
 0x132   :  { %v2355_v21 = vpop.eup %1904 }
 0x134   :  { %730 = vperm.xlu2 %1874, %v624_v15   ;;  %967 = vperm.xlu1 %1873, %v2318_v44   ;;  %v674_v15 = vmul.f32 1.442695, %v644_v9 }
 0x135   :  { %972 = vperm.xlu0 %1875, %v2320_v55  }
 0x136   :  { %1906 = vpow2.f32 %v674_v15  ;;  %v110_v15 = vld [vmem:[%s2656_s2 + $0x50] sm:$0xff] }
 0x13c   :  { %745 = vperm.xlu2 %1874, %v627_v28   ;;  %982 = vperm.xlu1 %1873, %v2327_v61   ;;  %v2357_v23 = vpop.eup %1906  ;;  %v102_v28 = vld [vmem:[%s2656_s2 + $0x10] sm:$0xff] }
 0x13d   :  { %755 = vperm.xlu0 %1875, %v629_v34   ;;  %1095 = vmatpush.msra.mxu2 %v102_v28 }
 0x144   :  { %977 = vperm.xlu2 %1874, %v2335_v7   ;;  %750 = vperm.xlu1 %1873, %v628_v35  }
 0x145   :  { %987 = vperm.xlu0 %1875, %v2333_v6  }
 0x14c   :  { %992 = vperm.xlu2 %1874, %v2340_v14   ;;  %997 = vperm.xlu1 %1873, %v2347_v18  }
 0x14d   :  { %1002 = vperm.xlu0 %1875, %v2345_v17  }
 0x154   :  { %1007 = vperm.xlu2 %1874, %v2357_v23   ;;  %1012 = vperm.xlu1 %1873, %v2355_v21  }
 0x15e   :  { %v686_v26 = vpop.permute.xlu2 %685 }
 0x15f   :  { %v759_v27 = vsub.f32 %v2127_v36, %v686_v26  ;;  %v107_v36 = vld [vmem:[%s2656_s2 + $0x38] sm:$0xff] }
 0x160   :  { %1210 = vmatpush.msrb.mxu3 %v107_v36  ;;  %v112_v36 = vld [vmem:[%s2656_s2 + $0x60] sm:$0xff] }
 0x161   :  { %v776_v30 = vmul.f32 1.442695, %v759_v27  ;;  %v113_v27 = vld [vmem:[%s2656_s2 + $0x68] sm:$0xff] }
 0x163   :  { %1908 = vpow2.f32 %v776_v30 }
 0x166   :  { %v696_v32 = vpop.permute.xlu2 %695 }
 0x167   :  { %v761_v34 = vsub.f32 %v2139_v46, %v696_v32  ;;  %v106_v46 = vld [vmem:[%s2656_s2 + $0x30] sm:$0xff] }
 0x168   :  { %1187 = vmatpush.msrb.mxu2 %v106_v46 }
 0x169   :  { %v1909_v35 = vpop.eup %1908  ;;  %v780_v40 = vmul.f32 1.442695, %v761_v34 }
 0x16a   :  { %1855 = vmatmul.msk.f32.vlgmr.msra.gmra.mxu1 %vm565_vm1, %v1909_v35  ;;  %v841_v9 = vsel %vm565_vm1, %v1909_v35, 0.0 }
 0x16b   :  { %1910 = vpow2.f32 %v780_v40  ;;  %1256 = vmatpush.msra.mxu1 %v109_v60  ;;  %v111_v40 = vld [vmem:[%s2656_s2 + $0x58] sm:$0xff] }
 0x16e   :  { %v681_v42 = vpop.permute.xlu1 %680  ;;  %v706_v43 = vpop.permute.xlu2 %705 }
 0x16f   :  { %v758_v45 = vsub.f32 %v2123_v33, %v681_v42  ;;  %v763_v52 = vsub.f32 %v2141_v47, %v706_v43 }
 0x171   :  { %v1911_v37 = vpop.eup %1910  ;;  %v774_v51 = vmul.f32 1.442695, %v758_v45  ;;  %v784_v56 = vmul.f32 1.442695, %v763_v52 }
 0x172   :  { %1857 = vmatmul.msk.f32.vlgmr.msra.gmra.mxu3 %vm565_vm1, %v1911_v37  ;;  %v847_v28 = vsel %vm565_vm1, %v1911_v37, 0.0 }
 0x173   :  { %1912 = vpow2.f32 %v774_v51  ;;  %1302 = vmatpush.msra.mxu3 %v111_v40 }
 0x174   :  { %1914 = vpow2.f32 %v784_v56  ;;  %v691_v33 = vpop.permute.xlu0 %690 }
 0x175   :  { %v760_v47 = vsub.f32 %v2129_v38, %v691_v33 }
 0x176   :  { %v701_v53 = vpop.permute.xlu1 %700  ;;  %v2389_v62 = vpop.permute.xlu2 %942 }
 0x177   :  { %v778_v63 = vmul.f32 1.442695, %v760_v47  ;;  %v762_v0 = vsub.f32 %v2131_v41, %v701_v53 }
 0x179   :  { %v1913_v5 = vpop.eup %1912  ;;  %1916 = vpow2.f32 %v778_v63  ;;  %v782_v54 = vmul.f32 1.442695, %v762_v0 }
 0x17a   :  { %v1915_v8 = vpop.eup %1914  ;;  %1854 = vmatmul.msk.f32.vlgmr.msra.gmra.mxu0 %vm565_vm1, %v1913_v5  ;;  %v838_v38 = vsel %vm565_vm1, %v1913_v5, 0.0 }
 0x17b   :  { %1918 = vpow2.f32 %v782_v54  ;;  %1859 = vmatmul.msk.f32.vlgmr.msrb.gmra.mxu1 %vm565_vm1, %v1915_v8  ;;  %1233 = vmatpush.msra.mxu0 %v108_v1 }
 0x17c   :  { %1348 = vmatpush.msrb.mxu1 %v113_v27 }
 0x17d   :  { %839 = vadd.xlane.f32.xlu2 %v838_v38 }
 0x17e   :  { %v2399_v41 = vpop.permute.xlu1 %937  ;;  %v716_v10 = vpop.permute.xlu2 %715  ;;  %842 = vadd.xlane.f32.xlu1 %v841_v9 }
 0x17f   :  { %v1917_v16 = vpop.eup %1916  ;;  %v765_v19 = vsub.f32 %v2157_v57, %v716_v10 }
 0x180   :  { %1856 = vmatmul.msk.f32.vlgmr.msra.gmra.mxu2 %vm565_vm1, %v1917_v16  ;;  %v844_v24 = vsel %vm565_vm1, %v1917_v16, 0.0 }
 0x181   :  { %v1919_v25 = vpop.eup %1918  ;;  %v788_v26 = vmul.f32 1.442695, %v765_v19  ;;  %845 = vadd.xlane.f32.xlu0 %v844_v24  ;;  %1279 = vmatpush.msra.mxu2 %v110_v15 }
 0x182   :  { %1858 = vmatmul.msk.f32.vlgmr.msrb.gmra.mxu0 %vm565_vm1, %v1919_v25  ;;  %v850_v57 = vsel %vm565_vm1, %v1919_v25, 0.0  ;;  %v114_v25 = vld [vmem:[%s2656_s2 + $0x70] sm:$0xff] }
 0x183   :  { %1920 = vpow2.f32 %v788_v26  ;;  %1325 = vmatpush.msrb.mxu0 %v112_v36 }
 0x185   :  { %848 = vadd.xlane.f32.xlu2 %v847_v28 }
 0x186   :  { %v711_v30 = vpop.permute.xlu1 %710  ;;  %v2413_v31 = vpop.permute.xlu2 %962  ;;  %851 = vadd.xlane.f32.xlu1 %v850_v57 }
 0x187   :  { %v764_v32 = vsub.f32 %v2145_v50, %v711_v30  ;;  %v726_v34 = vpop.permute.xlu0 %725  ;;  %v853_v50 = vsel %vm565_vm1, %v1915_v8, 0.0  ;;  %v115_v8 = vld [vmem:[%s2656_s2 + $0x78] sm:$0xff] }
 0x188   :  { %v767_v35 = vsub.f32 %v2161_v58, %v726_v34 }
 0x189   :  { %v1921_v42 = vpop.eup %1920  ;;  %v786_v43 = vmul.f32 1.442695, %v764_v32 }
 0x18a   :  { %v792_v45 = vmul.f32 1.442695, %v767_v35  ;;  %1861 = vmatmul.msk.f32.vlgmr.msrb.gmra.mxu3 %vm565_vm1, %v1921_v42  ;;  %v859_v58 = vsel %vm565_vm1, %v1921_v42, 0.0 }
 0x18b   :  { %1922 = vpow2.f32 %v786_v43  ;;  %1394 = vmatpush.msrb.mxu3 %v115_v8  ;;  %v806_v8 = vld [vmem:[#allocation3] sm:$0xff] }
 0x18c   :  { %1924 = vpow2.f32 %v792_v45 }
 0x18d   :  { %854 = vadd.xlane.f32.xlu2 %v853_v50 }
 0x18e   :  { %v721_v52 = vpop.permute.xlu1 %720  ;;  %v731_v37 = vpop.permute.xlu2 %730  ;;  %860 = vadd.xlane.f32.xlu1 %v859_v58 }
 0x18f   :  { %v766_v51 = vsub.f32 %v2163_v59, %v721_v52  ;;  %v768_v56 = vsub.f32 %v2177_v2, %v731_v37  ;;  %v2428_v46 = vpop.permute.xlu0 %947 }
 0x191   :  { %v1923_v60 = vpop.eup %1922  ;;  %v790_v33 = vmul.f32 1.442695, %v766_v51  ;;  %v794_v47 = vmul.f32 1.442695, %v768_v56 }
 0x192   :  { %v1925_v53 = vpop.eup %1924  ;;  %1860 = vmatmul.msk.f32.vlgmr.msrb.gmra.mxu2 %vm565_vm1, %v1923_v60  ;;  %v856_v63 = vsel %vm565_vm1, %v1923_v60, 0.0 }
 0x193   :  { %1926 = vpow2.f32 %v790_v33  ;;  %1863 = vmatmul.msk.f32.vlgmr.msra.gmra.mxu1 %vm565_vm1, %v1925_v53  ;;  %857 = vadd.xlane.f32.xlu0 %v856_v63  ;;  %v865_v10 = vsel %vm565_vm1, %v1925_v53, 0.0 }
 0x194   :  { %1928 = vpow2.f32 %v794_v47  ;;  %1371 = vmatpush.msrb.mxu2 %v114_v25  ;;  %v920_v47 = vld [vmem:[#allocation4 + $0x8] sm:$0xff]  ;;  %v919_v25 = vld [vmem:[#allocation4] sm:$0xff] }
 0x195   :  { %v1016_v53 = vmul.f32 %v2389_v62, %v920_v47  ;;  %v813_v47 = vld [vmem:[#allocation3 + $0x38] sm:$0xff] }
 0x196   :  { %v2433_v0 = vpop.permute.xlu1 %952  ;;  %v746_v59 = vpop.permute.xlu2 %745 }
 0x197   :  { %v771_v2 = vsub.f32 %v2191_v11, %v746_v59  ;;  %v2436_v5 = vpop.permute.xlu0 %957 }
 0x199   :  { %v1927_v54 = vpop.eup %1926  ;;  %v800_v1 = vmul.f32 1.442695, %v771_v2 }
 0x19a   :  { %v1929_v38 = vpop.eup %1928  ;;  %1862 = vmatmul.msk.f32.vlgmr.msra.gmra.mxu0 %vm565_vm1, %v1927_v54  ;;  %v862_v9 = vsel %vm565_vm1, %v1927_v54, 0.0 }
 0x19b   :  { %1930 = vpow2.f32 %v800_v1  ;;  %1864 = vmatmul.msk.f32.vlgmr.msra.gmra.mxu2 %vm565_vm1, %v1929_v38  ;;  %863 = vadd.xlane.f32.xlu2 %v862_v9  ;;  %v868_v11 = vsel %vm565_vm1, %v1929_v38, 0.0  ;;  %v807_v38 = vld [vmem:[#allocation3 + $0x8] sm:$0xff]  ;;  %v822_v9 = vmul.f32 %v2248_v48, %v806_v8  ;;  %v809_v48 = vld [vmem:[#allocation3 + $0x18] sm:$0xff] }
 0x19c   :  { %869 = vadd.xlane.f32.xlu1 %v868_v11  ;;  %866 = vadd.xlane.f32.xlu0 %v865_v10  ;;  %v823_v10 = vmul.f32 %v2285_v20, %v807_v38  ;;  %v810_v20 = vld [vmem:[#allocation3 + $0x20] sm:$0xff] }
 0x19e   :  { %v736_v15 = vpop.permute.xlu1 %735 }
 0x19f   :  { %v769_v16 = vsub.f32 %v2181_v3, %v736_v15  ;;  %v741_v19 = vpop.permute.xlu0 %740  ;;  %v808_v15 = vld [vmem:[#allocation3 + $0x10] sm:$0xff] }
 0x1a0   :  { %v770_v24 = vsub.f32 %v2183_v4, %v741_v19 }
 0x1a1   :  { %v1931_v26 = vpop.eup %1930  ;;  %v796_v27 = vmul.f32 1.442695, %v769_v16  ;;  %v922_v16 = vld [vmem:[#allocation4 + $0x18] sm:$0xff] }
 0x1a2   :  { %v798_v28 = vmul.f32 1.442695, %v770_v24  ;;  %1867 = vmatmul.msk.f32.vlgmr.msrb.gmra.mxu1 %vm565_vm1, %v1931_v26  ;;  %v877_v57 = vsel %vm565_vm1, %v1931_v26, 0.0  ;;  %v824_v26 = vmul.f32 %v2288_v22, %v808_v15  ;;  %v825_v22 = vmul.f32 %v2299_v29, %v809_v48  ;;  %v811_v29 = vld [vmem:[#allocation3 + $0x28] sm:$0xff] }
 0x1a3   :  { %1932 = vpow2.f32 %v796_v27  ;;  %v924_v27 = vld [vmem:[#allocation4 + $0x28] sm:$0xff]  ;;  %v827_v8 = vmul.f32 %v2312_v49, %v811_v29 }
 0x1a4   :  { %1934 = vpow2.f32 %v798_v28  ;;  %878 = vadd.xlane.f32.xlu1 %v877_v57  ;;  %v1018_v28 = vmul.f32 %v2433_v0, %v922_v16 }
 0x1a6   :  { %v2453_v30 = vpop.permute.xlu1 %967 }
 0x1a7   :  { %v2455_v3 = vpop.permute.xlu0 %972 }
 0x1a9   :  { %v1933_v4 = vpop.eup %1932 }
 0x1aa   :  { %v1935_v32 = vpop.eup %1934  ;;  %1865 = vmatmul.msk.f32.vlgmr.msra.gmra.mxu3 %vm565_vm1, %v1933_v4  ;;  %v871_v34 = vsel %vm565_vm1, %v1933_v4, 0.0 }
 0x1ab   :  { %1866 = vmatmul.msk.f32.vlgmr.msrb.gmra.mxu0 %vm565_vm1, %v1935_v32  ;;  %872 = vadd.xlane.f32.xlu2 %v871_v34  ;;  %v874_v35 = vsel %vm565_vm1, %v1935_v32, 0.0  ;;  %v1015_v34 = vmul.f32 %v2399_v41, %v919_v25 }
 0x1ac   :  { %875 = vadd.xlane.f32.xlu0 %v874_v35 }
 0x1ae   :  { %v2461_v40 = vpop.permute.xlu1 %982 }
 0x1af   :  { %v756_v36 = vpop.permute.xlu0 %755 }
 0x1b0   :  { %v773_v42 = vsub.f32 %v2193_v12, %v756_v36  ;;  %v2469_v12 = vpop.permute.xlu2 %977  ;;  %v1020_v36 = vmul.f32 %v2413_v31, %v924_v27  ;;  %v923_v31 = vld [vmem:[#allocation4 + $0x20] sm:$0xff]  ;;  %v926_v27 = vld [vmem:[#allocation4 + $0x38] sm:$0xff] }
 0x1b2   :  { %v804_v43 = vmul.f32 1.442695, %v773_v42 }
 0x1b4   :  { %1936 = vpow2.f32 %v804_v43 }
 0x1b6   :  { %v751_v45 = vpop.permute.xlu1 %750 }
 0x1b7   :  { %v772_v50 = vsub.f32 %v2195_v13, %v751_v45  ;;  %v2475_v13 = vpop.permute.xlu0 %987 }
 0x1b8   :  { %v2471_v60 = vpop.permute.xlu2 %992 }
 0x1b9   :  { %v802_v58 = vmul.f32 1.442695, %v772_v50  ;;  %v826_v50 = vmul.f32 %v2303_v39, %v810_v20  ;;  %v1019_v39 = vmul.f32 %v2436_v5, %v923_v31  ;;  %v1022_v20 = vmul.f32 %v2455_v3, %v926_v27 }
 0x1ba   :  { %v1937_v52 = vpop.eup %1936 }
 0x1bb   :  { %1938 = vpow2.f32 %v802_v58  ;;  %1869 = vmatmul.msk.f32.vlgmr.msrb.gmra.mxu3 %vm565_vm1, %v1937_v52  ;;  %v883_v37 = vsel %vm565_vm1, %v1937_v52, 0.0 }
 0x1bc   :  { %884 = vadd.xlane.f32.xlu0 %v883_v37 }
 0x1be   :  { %v2473_v33 = vpop.permute.xlu1 %997 }
 0x1bf   :  { %v2483_v1 = vpop.permute.xlu0 %1002 }
 0x1c0   :  { %v2478_v59 = vpop.permute.xlu2 %1007 }
 0x1c1   :  { %v1939_v51 = vpop.eup %1938 }
 0x1c2   :  { %1868 = vmatmul.msk.f32.vlgmr.msrb.gmra.mxu2 %vm565_vm1, %v1939_v51  ;;  %v880_v56 = vsel %vm565_vm1, %v1939_v51, 0.0 }
 0x1c3   :  { %881 = vadd.xlane.f32.xlu2 %v880_v56 }
 0x1c6   :  { %v2480_v54 = vpop.permute.xlu1 %1012 }
 0x1e7   :  { %v1074_v63 = vpop.f32.mrf.mxu1 }
 0x1e8   :  { %v1400_v2 = vadd.f32 %v1074_v63, %v1016_v53  ;;  %v921_v63 = vld [vmem:[#allocation4 + $0x10] sm:$0xff] }
 0x1e9   :  { %v1017_v16 = vmul.f32 %v2428_v46, %v921_v63 }
 0x1ea   :  { %1416 = vst.msk [vmem:[#allocation4 + $0x8] sm:$0xff] %vm51_vm0, %v1400_v2 }
 0x1f0   :  { %v840_v11 = vpop.xlane.xlu2 %839 }
 0x1f1   :  { %v886_v62 = vadd.f32 %v840_v11, %v822_v9  ;;  %v843_v19 = vpop.xlane.xlu1 %842  ;;  %v829_v11 = vmul.f32 %v2320_v55, %v813_v47 }
 0x1f2   :  { %v887_v24 = vadd.f32 %v843_v19, %v823_v10  ;;  %v812_v19 = vld [vmem:[#allocation3 + $0x30] sm:$0xff] }
 0x1f3   :  { %903 = vst.msk [vmem:[#allocation3] sm:$0xff] %vm18_vm2, %v886_v62  ;;  %v828_v55 = vmul.f32 %v2318_v44, %v812_v19 }
 0x1f4   :  { %904 = vst.msk [vmem:[#allocation3 + $0x8] sm:$0xff] %vm18_vm2, %v887_v24  ;;  %v846_v57 = vpop.xlane.xlu0 %845 }
 0x1f5   :  { %v888_v4 = vadd.f32 %v846_v57, %v824_v26  ;;  %v1120_v32 = vpop.f32.mrf.mxu3  ;;  %v814_v57 = vld [vmem:[#allocation3 + $0x40] sm:$0xff] }
 0x1f6   :  { %v1402_v35 = vadd.f32 %v1120_v32, %v1018_v28  ;;  %v815_v32 = vld [vmem:[#allocation3 + $0x48] sm:$0xff]  ;;  %v830_v44 = vmul.f32 %v2335_v7, %v814_v57 }
 0x1f7   :  { %905 = vst.msk [vmem:[#allocation3 + $0x10] sm:$0xff] %vm18_vm2, %v888_v4  ;;  %v1051_v42 = vpop.f32.mrf.mxu0  ;;  %v816_v4 = vld [vmem:[#allocation3 + $0x50] sm:$0xff] }
 0x1f8   :  { %1418 = vst.msk [vmem:[#allocation4 + $0x18] sm:$0xff] %vm51_vm0, %v1402_v35  ;;  %v1399_v0 = vadd.f32 %v1051_v42, %v1015_v34  ;;  %v1166_v43 = vpop.f32.mrf.mxu1  ;;  %v849_v45 = vpop.xlane.xlu2 %848  ;;  %v928_v34 = vld [vmem:[#allocation4 + $0x48] sm:$0xff] }
 0x1f9   :  { %v1404_v58 = vadd.f32 %v1166_v43, %v1020_v36  ;;  %v889_v52 = vadd.f32 %v849_v45, %v825_v22  ;;  %v852_v37 = vpop.xlane.xlu1 %851  ;;  %v832_v22 = vmul.f32 %v2333_v6, %v816_v4  ;;  %v1024_v43 = vmul.f32 %v2461_v40, %v928_v34  ;;  %v927_v6 = vld [vmem:[#allocation4 + $0x40] sm:$0xff]  ;;  %v821_v4 = vld [vmem:[#allocation3 + $0x78] sm:$0xff] }
 0x1fa   :  { %1415 = vst.msk [vmem:[#allocation4] sm:$0xff] %vm51_vm0, %v1399_v0  ;;  %v890_v41 = vadd.f32 %v852_v37, %v826_v50  ;;  %v1466_v51 = vld [vmem:[#allocation3] sm:$0xff]  ;;  %v831_v0 = vmul.f32 %v2327_v61, %v815_v32  ;;  %v819_v61 = vld [vmem:[#allocation3 + $0x68] sm:$0xff] }
 0x1fb   :  { %1420 = vst.msk [vmem:[#allocation4 + $0x28] sm:$0xff] %vm51_vm0, %v1404_v58  ;;  %1484 = vperm.xlu0 %1875, %v1466_v51   ;;  %v1467_v56 = vld [vmem:[#allocation3 + $0x8] sm:$0xff]  ;;  %v925_v51 = vld [vmem:[#allocation4 + $0x30] sm:$0xff]  ;;  %v835_v47 = vmul.f32 %v2345_v17, %v819_v61  ;;  %v818_v17 = vld [vmem:[#allocation3 + $0x60] sm:$0xff] }
 0x1fc   :  { %906 = vst.msk [vmem:[#allocation3 + $0x18] sm:$0xff] %vm18_vm2, %v889_v52  ;;  %1489 = vperm.xlu2 %1874, %v1467_v56   ;;  %v1021_v40 = vmul.f32 %v2453_v30, %v925_v51  ;;  %v1023_v56 = vmul.f32 %v2469_v12, %v927_v6 }
 0x1fd   :  { %907 = vst.msk [vmem:[#allocation3 + $0x20] sm:$0xff] %vm18_vm2, %v890_v41 }
 0x1fe   :  { %v1468_v53 = vld [vmem:[#allocation3 + $0x10] sm:$0xff] }
 0x1ff   :  { %v1143_v2 = vpop.f32.mrf.mxu0  ;;  %1494 = vperm.xlu1 %1873, %v1468_v53  }
 0x200   :  { %v1403_v38 = vadd.f32 %v1143_v2, %v1019_v39  ;;  %v855_v9 = vpop.xlane.xlu2 %854 }
 0x201   :  { %v891_v10 = vadd.f32 %v855_v9, %v827_v8  ;;  %v861_v15 = vpop.xlane.xlu1 %860  ;;  %v929_v9 = vld [vmem:[#allocation4 + $0x50] sm:$0xff] }
 0x202   :  { %1419 = vst.msk [vmem:[#allocation4 + $0x20] sm:$0xff] %vm51_vm0, %v1403_v38  ;;  %v893_v62 = vadd.f32 %v861_v15, %v829_v11  ;;  %v817_v11 = vld [vmem:[#allocation3 + $0x58] sm:$0xff]  ;;  %v1025_v12 = vmul.f32 %v2475_v13, %v929_v9 }
 0x203   :  { %908 = vst.msk [vmem:[#allocation3 + $0x28] sm:$0xff] %vm18_vm2, %v891_v10  ;;  %v1097_v5 = vpop.f32.mrf.mxu2  ;;  %v1469_v24 = vld [vmem:[#allocation3 + $0x18] sm:$0xff]  ;;  %v932_v10 = vld [vmem:[#allocation4 + $0x68] sm:$0xff]  ;;  %v833_v15 = vmul.f32 %v2340_v14, %v817_v11  ;;  %v931_v14 = vld [vmem:[#allocation4 + $0x60] sm:$0xff] }
 0x204   :  { %910 = vst.msk [vmem:[#allocation3 + $0x38] sm:$0xff] %vm18_vm2, %v893_v62  ;;  %v1401_v25 = vadd.f32 %v1097_v5, %v1017_v16  ;;  %1499 = vperm.xlu0 %1875, %v1469_v24   ;;  %v1470_v49 = vld [vmem:[#allocation3 + $0x20] sm:$0xff]  ;;  %v1028_v16 = vmul.f32 %v2483_v1, %v932_v10  ;;  %v834_v5 = vmul.f32 %v2347_v18, %v818_v17  ;;  %v930_v1 = vld [vmem:[#allocation4 + $0x58] sm:$0xff] }
 0x205   :  { %1504 = vperm.xlu2 %1874, %v1470_v49   ;;  %v1027_v13 = vmul.f32 %v2473_v33, %v931_v14  ;;  %v1026_v32 = vmul.f32 %v2471_v60, %v930_v1 }
 0x206   :  { %1417 = vst.msk [vmem:[#allocation4 + $0x10] sm:$0xff] %vm51_vm0, %v1401_v25  ;;  %v858_v26 = vpop.xlane.xlu0 %857 }
 0x207   :  { %v892_v46 = vadd.f32 %v858_v26, %v828_v55 }
 0x209   :  { %909 = vst.msk [vmem:[#allocation3 + $0x30] sm:$0xff] %vm18_vm2, %v892_v46 }
 0x20a   :  { %v1471_v28 = vld [vmem:[#allocation3 + $0x28] sm:$0xff] }
 0x20b   :  { %1509 = vperm.xlu1 %1873, %v1471_v28   ;;  %v1473_v48 = vld [vmem:[#allocation3 + $0x38] sm:$0xff] }
 0x20d   :  { %1519 = vperm.xlu2 %1874, %v1473_v48   ;;  %v1212_v35 = vpop.f32.mrf.mxu3 }
 0x20e   :  { %v1406_v36 = vadd.f32 %v1212_v35, %v1022_v20  ;;  %v864_v42 = vpop.xlane.xlu2 %863  ;;  %v837_v35 = vmul.f32 %v2355_v21, %v821_v4 }
 0x20f   :  { %v894_v45 = vadd.f32 %v864_v42, %v830_v44  ;;  %v870_v50 = vpop.xlane.xlu1 %869  ;;  %v867_v58 = vpop.xlane.xlu0 %866 }
 0x210   :  { %1422 = vst.msk [vmem:[#allocation4 + $0x38] sm:$0xff] %vm51_vm0, %v1406_v36  ;;  %v896_v52 = vadd.f32 %v870_v50, %v832_v22  ;;  %v895_v3 = vadd.f32 %v867_v58, %v831_v0  ;;  %v1258_v37 = vpop.f32.mrf.mxu1  ;;  %v1472_v41 = vld [vmem:[#allocation3 + $0x30] sm:$0xff] }
 0x211   :  { %911 = vst.msk [vmem:[#allocation3 + $0x40] sm:$0xff] %vm18_vm2, %v894_v45  ;;  %v1408_v7 = vadd.f32 %v1258_v37, %v1024_v43  ;;  %1514 = vperm.xlu0 %1875, %v1472_v41   ;;  %v820_v36 = vld [vmem:[#allocation3 + $0x70] sm:$0xff]  ;;  %v934_v45 = vld [vmem:[#allocation4 + $0x78] sm:$0xff] }
 0x212   :  { %913 = vst.msk [vmem:[#allocation3 + $0x50] sm:$0xff] %vm18_vm2, %v896_v52  ;;  %v836_v42 = vmul.f32 %v2357_v23, %v820_v36  ;;  %v1030_v60 = vmul.f32 %v2480_v54, %v934_v45  ;;  %v933_v52 = vld [vmem:[#allocation4 + $0x70] sm:$0xff] }
 0x213   :  { %912 = vst.msk [vmem:[#allocation3 + $0x48] sm:$0xff] %vm18_vm2, %v895_v3  ;;  %v1029_v3 = vmul.f32 %v2478_v59, %v933_v52 }
 0x214   :  { %1424 = vst.msk [vmem:[#allocation4 + $0x48] sm:$0xff] %vm51_vm0, %v1408_v7 }
 0x215   :  { %v1189_v31 = vpop.f32.mrf.mxu2 }
 0x216   :  { %v1405_v29 = vadd.f32 %v1189_v31, %v1021_v40 }
 0x217   :  { %v879_v39 = vpop.xlane.xlu1 %878  ;;  %v1235_v53 = vpop.f32.mrf.mxu0 }
 0x218   :  { %1421 = vst.msk [vmem:[#allocation4 + $0x30] sm:$0xff] %vm51_vm0, %v1405_v29  ;;  %v899_v63 = vadd.f32 %v879_v39, %v835_v47  ;;  %v1407_v2 = vadd.f32 %v1235_v53, %v1023_v56  ;;  %v1474_v8 = vld [vmem:[#allocation3 + $0x40] sm:$0xff]  ;;  %v1451_v39 = vld [vmem:[#allocation4 + $0x8] sm:$0xff] }
 0x219   :  { %v1476_v38 = vld [vmem:[#allocation3 + $0x50] sm:$0xff]  ;;  %1524 = vperm.xlu1 %1873, %v1474_v8  }
 0x21a   :  { %916 = vst.msk [vmem:[#allocation3 + $0x68] sm:$0xff] %vm18_vm2, %v899_v63  ;;  %1534 = vperm.xlu2 %1874, %v1476_v38   ;;  %v1475_v30 = vld [vmem:[#allocation3 + $0x48] sm:$0xff] }
 0x21b   :  { %1423 = vst.msk [vmem:[#allocation4 + $0x40] sm:$0xff] %vm51_vm0, %v1407_v2  ;;  %1529 = vperm.xlu0 %1875, %v1475_v30  }
 0x21e   :  { %v1281_v62 = vpop.f32.mrf.mxu2  ;;  %v873_v19 = vpop.xlane.xlu2 %872 }
 0x21f   :  { %v1409_v24 = vadd.f32 %v1281_v62, %v1025_v12  ;;  %v897_v25 = vadd.f32 %v873_v19, %v833_v15  ;;  %v876_v49 = vpop.xlane.xlu0 %875  ;;  %v1350_v55 = vpop.f32.mrf.mxu1  ;;  %v1454_v19 = vld [vmem:[#allocation4 + $0x20] sm:$0xff] }
 0x220   :  { %v898_v26 = vadd.f32 %v876_v49, %v834_v5  ;;  %v1412_v46 = vadd.f32 %v1350_v55, %v1028_v16 }
 0x221   :  { %1425 = vst.msk [vmem:[#allocation4 + $0x50] sm:$0xff] %vm51_vm0, %v1409_v24  ;;  %v1479_v27 = vld [vmem:[#allocation3 + $0x68] sm:$0xff] }
 0x222   :  { %914 = vst.msk [vmem:[#allocation3 + $0x58] sm:$0xff] %vm18_vm2, %v897_v25  ;;  %1549 = vperm.xlu2 %1874, %v1479_v27  }
 0x223   :  { %915 = vst.msk [vmem:[#allocation3 + $0x60] sm:$0xff] %vm18_vm2, %v898_v26 }
 0x224   :  { %1428 = vst.msk [vmem:[#allocation4 + $0x68] sm:$0xff] %vm51_vm0, %v1412_v46 }
 0x228   :  { %v1327_v18 = vpop.f32.mrf.mxu0 }
 0x229   :  { %v1411_v28 = vadd.f32 %v1327_v18, %v1027_v13  ;;  %v1477_v57 = vld [vmem:[#allocation3 + $0x58] sm:$0xff] }
 0x22a   :  { %1539 = vperm.xlu1 %1873, %v1477_v57   ;;  %v1478_v48 = vld [vmem:[#allocation3 + $0x60] sm:$0xff] }
 0x22b   :  { %1427 = vst.msk [vmem:[#allocation4 + $0x60] sm:$0xff] %vm51_vm0, %v1411_v28  ;;  %1544 = vperm.xlu0 %1875, %v1478_v48  }
 0x22d   :  { %v1304_v20 = vpop.f32.mrf.mxu3 }
 0x22e   :  { %v1410_v34 = vadd.f32 %v1304_v20, %v1026_v32  ;;  %v1457_v20 = vld [vmem:[#allocation4 + $0x38] sm:$0xff] }
 0x22f   :  { %v885_v44 = vpop.xlane.xlu0 %884 }
 0x230   :  { %1426 = vst.msk [vmem:[#allocation4 + $0x58] sm:$0xff] %vm51_vm0, %v1410_v34  ;;  %v901_v33 = vadd.f32 %v885_v44, %v837_v35 }
 0x232   :  { %918 = vst.msk [vmem:[#allocation3 + $0x78] sm:$0xff] %vm18_vm2, %v901_v33 }
 0x236   :  { %v882_v22 = vpop.xlane.xlu2 %881 }
 0x237   :  { %v900_v0 = vadd.f32 %v882_v22, %v836_v42 }
 0x239   :  { %917 = vst.msk [vmem:[#allocation3 + $0x70] sm:$0xff] %vm18_vm2, %v900_v0  ;;  %v1481_v43 = vld [vmem:[#allocation3 + $0x78] sm:$0xff] }
 0x23a   :  { %1559 = vperm.xlu0 %1875, %v1481_v43  }
 0x23e   :  { %v1396_v50 = vpop.f32.mrf.mxu3 }
 0x23f   :  { %v1414_v21 = vadd.f32 %v1396_v50, %v1030_v60 }
 0x240   :  { %v1480_v58 = vld [vmem:[#allocation3 + $0x70] sm:$0xff] }
 0x241   :  { %1430 = vst.msk [vmem:[#allocation4 + $0x78] sm:$0xff] %vm51_vm0, %v1414_v21  ;;  %1554 = vperm.xlu1 %1873, %v1480_v58  }
 0x245   :  { %v1373_v37 = vpop.f32.mrf.mxu2 }
 0x246   :  { %v1413_v23 = vadd.f32 %v1373_v37, %v1029_v3 }
 0x248   :  { %1429 = vst.msk [vmem:[#allocation4 + $0x70] sm:$0xff] %vm51_vm0, %v1413_v23 }
 0x256   :  { %v1490_v41 = vpop.permute.xlu2 %1489 }
 0x257   :  { %1940 = vrcp.f32 %v1490_v41  ;;  %v1588_v54 = vand.u32 2147483648, %v1490_v41  ;;  %v1586_v31 = vand.u32 2147483647, %v1490_v41  ;;  %vm1582_vm4 = vweird.f32 %v1490_v41 }
 0x259   :  { %v1589_v29 = vor.u32 1.1754944e-38, %v1588_v54  ;;  %vm1587_vm6 = vcmp.eq.f32.partialorder %v1586_v31, 8.507059e+37 }
 0x25d   :  { %v1941_v51 = vpop.eup %1940 }
 0x25e   :  { %v1578_v7 = vmul.f32 %v1941_v51, %v1490_v41  ;;  %vm1583_vm3 = vweird.f32 %v1941_v51  ;;  %v1450_v41 = vld [vmem:[#allocation4] sm:$0xff] }
 0x25f   :  { %v1505_v6 = vpop.permute.xlu2 %1504  ;;  %vm1584_vm5 = vmor %vm1582_vm4, %vm1583_vm3 }
 0x260   :  { %v1579_v61 = vsub.f32 1.0, %v1578_v7  ;;  %1942 = vrcp.f32 %v1505_v6  ;;  %v1633_v9 = vand.u32 2147483648, %v1505_v6  ;;  %v1631_v11 = vand.u32 2147483647, %v1505_v6 }
 0x261   :  { %vm1627_vm8 = vweird.f32 %v1505_v6 }
 0x262   :  { %v1580_v40 = vmul.f32 %v1941_v51, %v1579_v61  ;;  %v1634_v15 = vor.u32 1.1754944e-38, %v1633_v9  ;;  %vm1632_vm10 = vcmp.eq.f32.partialorder %v1631_v11, 8.507059e+37 }
 0x264   :  { %v1581_v56 = vadd.f32 %v1941_v51, %v1580_v40 }
 0x266   :  { %v1943_v59 = vpop.eup %1942  ;;  %v1585_v47 = vsel %vm1584_vm5, %v1941_v51, %v1581_v56 }
 0x267   :  { %v1590_v53 = vsel %vm1587_vm6, %v1589_v29, %v1585_v47  ;;  %v1623_v63 = vmul.f32 %v1943_v59, %v1505_v6  ;;  %v1520_v2 = vpop.permute.xlu2 %1519  ;;  %vm1628_vm7 = vweird.f32 %v1943_v59 }
 0x268   :  { %v1591_v8 = vmul.f32 %v1590_v53, %v1451_v39  ;;  %1944 = vrcp.f32 %v1520_v2  ;;  %vm1629_vm9 = vmor %vm1627_vm8, %vm1628_vm7  ;;  %v1676_v55 = vand.u32 2147483647, %v1520_v2  ;;  %v1678_v26 = vand.u32 2147483648, %v1520_v2 }
 0x269   :  { %v1624_v38 = vsub.f32 1.0, %v1623_v63  ;;  %vm1672_vm12 = vweird.f32 %v1520_v2  ;;  %v1452_v63 = vld [vmem:[#allocation4 + $0x10] sm:$0xff] }
 0x26a   :  { %1803 = vst.msk [vmem:[%s2657_s3 + $0x8] sm:$0xff] %vm51_vm0, %v1591_v8  ;;  %vm1677_vm14 = vcmp.eq.f32.partialorder %v1676_v55, 8.507059e+37  ;;  %v1679_v1 = vor.u32 1.1754944e-38, %v1678_v26  ;;  %v1453_v55 = vld [vmem:[#allocation4 + $0x18] sm:$0xff] }
 0x26b   :  { %v1625_v30 = vmul.f32 %v1943_v59, %v1624_v38 }
 0x26d   :  { %v1626_v10 = vadd.f32 %v1943_v59, %v1625_v30  ;;  %v1485_v17 = vpop.permute.xlu0 %1484 }
 0x26e   :  { %v1945_v12 = vpop.eup %1944  ;;  %1946 = vrcp.f32 %v1485_v17  ;;  %v1571_v4 = vand.u32 2147483647, %v1485_v17  ;;  %v1573_v35 = vand.u32 2147483648, %v1485_v17  ;;  %vm1567_vm1 = vweird.f32 %v1485_v17 }
 0x26f   :  { %v1630_v16 = vsel %vm1629_vm9, %v1943_v59, %v1626_v10  ;;  %v1668_v62 = vmul.f32 %v1945_v12, %v1520_v2  ;;  %vm1673_vm11 = vweird.f32 %v1945_v12 }
 0x270   :  { %v1635_v5 = vsel %vm1632_vm10, %v1634_v15, %v1630_v16  ;;  %vm1674_vm13 = vmor %vm1672_vm12, %vm1673_vm11  ;;  %vm1572_vm2 = vcmp.eq.f32.partialorder %v1571_v4, 8.507059e+37  ;;  %v1574_v60 = vor.u32 1.1754944e-38, %v1573_v35  ;;  %v1460_v16 = vld [vmem:[#allocation4 + $0x50] sm:$0xff] }
 0x271   :  { %v1636_v24 = vmul.f32 %v1635_v5, %v1454_v19  ;;  %v1669_v25 = vsub.f32 1.0, %v1668_v62  ;;  %v1495_v49 = vpop.permute.xlu1 %1494 }
 0x272   :  { %1948 = vrcp.f32 %v1495_v49  ;;  %v1601_v44 = vand.u32 2147483647, %v1495_v49  ;;  %v1603_v22 = vand.u32 2147483648, %v1495_v49  ;;  %vm1597_vm4 = vweird.f32 %v1495_v49 }
 0x273   :  { %1806 = vst.msk [vmem:[%s2657_s3 + $0x20] sm:$0xff] %vm51_vm0, %v1636_v24  ;;  %v1670_v46 = vmul.f32 %v1945_v12, %v1669_v25 }
 0x274   :  { %v1947_v27 = vpop.eup %1946  ;;  %v2555_v14 = vpop.permute.xlu2 %1534  ;;  %vm2565_vm5 = vcmp.eq.f32.partialorder %v1601_v44, 8.507059e+37  ;;  %v1604_v7 = vor.u32 1.1754944e-38, %v1603_v22 }
 0x275   :  { %v1671_v13 = vadd.f32 %v1945_v12, %v1670_v46  ;;  %v1563_v18 = vmul.f32 %v1947_v27, %v1485_v17  ;;  %1950 = vrcp.f32 %v2555_v14  ;;  %vm1568_vm15 = vweird.f32 %v1947_v27 }
 0x276   :  { %v2558_v28 = vpop.permute.xlu0 %1499  ;;  %vm1569_vm3 = vmor %vm1567_vm1, %vm1568_vm15  ;;  %v1721_v31 = vand.u32 2147483647, %v2555_v14  ;;  %v1723_v56 = vand.u32 2147483648, %v2555_v14  ;;  %vm1717_vm9 = vweird.f32 %v2555_v14 }
 0x277   :  { %v1675_v57 = vsel %vm1674_vm13, %v1945_v12, %v1671_v13  ;;  %v1564_v48 = vsub.f32 1.0, %v1563_v18  ;;  %1952 = vrcp.f32 %v2558_v28  ;;  %v1616_v39 = vand.u32 2147483647, %v2558_v28 }
 0x278   :  { %v1949_v32 = vpop.eup %1948  ;;  %v1680_v34 = vsel %vm1677_vm14, %v1679_v1, %v1675_v57  ;;  %v1618_v53 = vand.u32 2147483648, %v2558_v28  ;;  %v1724_v11 = vor.u32 1.1754944e-38, %v1723_v56  ;;  %vm1612_vm12 = vweird.f32 %v2558_v28 }
 0x279   :  { %v1681_v33 = vmul.f32 %v1680_v34, %v1457_v20  ;;  %v1565_v36 = vmul.f32 %v1947_v27, %v1564_v48  ;;  %v1593_v42 = vmul.f32 %v1949_v32, %v1495_v49  ;;  %vm1598_vm6 = vweird.f32 %v1949_v32 }
 0x27a   :  { %vm1599_vm7 = vmor %vm1597_vm4, %vm1598_vm6  ;;  %vm1722_vm13 = vcmp.eq.f32.partialorder %v1721_v31, 8.507059e+37  ;;  %v1619_v19 = vor.u32 1.1754944e-38, %v1618_v53  ;;  %vm1617_vm15 = vcmp.eq.f32.partialorder %v1616_v39, 8.507059e+37 }
 0x27b   :  { %v1951_v0 = vpop.eup %1950  ;;  %1809 = vst.msk [vmem:[%s2657_s3 + $0x38] sm:$0xff] %vm51_vm0, %v1681_v33  ;;  %v1566_v43 = vadd.f32 %v1947_v27, %v1565_v36  ;;  %v1594_v45 = vsub.f32 1.0, %v1593_v42  ;;  %v1463_v33 = vld [vmem:[#allocation4 + $0x68] sm:$0xff] }
 0x27c   :  { %v1713_v21 = vmul.f32 %v1951_v0, %v2555_v14  ;;  %v2570_v58 = vpop.permute.xlu2 %1549  ;;  %vm1718_vm8 = vweird.f32 %v1951_v0 }
 0x27d   :  { %v1953_v52 = vpop.eup %1952  ;;  %v1570_v3 = vsel %vm1569_vm3, %v1947_v27, %v1566_v43  ;;  %v1595_v37 = vmul.f32 %v1949_v32, %v1594_v45  ;;  %1954 = vrcp.f32 %v2570_v58  ;;  %v2573_v23 = vpop.permute.xlu1 %1509  ;;  %vm1719_vm11 = vmor %vm1717_vm9, %vm1718_vm8  ;;  %v1768_v46 = vand.u32 2147483648, %v2570_v58 }
 0x27e   :  { %v1575_v51 = vsel %vm1572_vm2, %v1574_v60, %v1570_v3  ;;  %v1714_v6 = vsub.f32 1.0, %v1713_v21  ;;  %v1608_v61 = vmul.f32 %v1953_v52, %v2558_v28  ;;  %1956 = vrcp.f32 %v2573_v23  ;;  %v1455_v21 = vld [vmem:[#allocation4 + $0x28] sm:$0xff] }
 0x27f   :  { %v1576_v54 = vmul.f32 %v1575_v51, %v1450_v41  ;;  %v1596_v40 = vadd.f32 %v1949_v32, %v1595_v37  ;;  %vm1613_vm10 = vweird.f32 %v1953_v52  ;;  %v1766_v18 = vand.u32 2147483647, %v2570_v58 }
 0x280   :  { %v1715_v29 = vmul.f32 %v1951_v0, %v1714_v6  ;;  %v1609_v59 = vsub.f32 1.0, %v1608_v61  ;;  %vm1614_vm14 = vmor %vm1612_vm12, %vm1613_vm10  ;;  %vm1762_vm2 = vweird.f32 %v2570_v58  ;;  %v1648_v57 = vand.u32 2147483648, %v2573_v23 }
 0x281   :  { %1802 = vst.msk [vmem:[%s2657_s3] sm:$0xff] %vm51_vm0, %v1576_v54  ;;  %v1600_v47 = vsel %vm1599_vm7, %v1949_v32, %v1596_v40  ;;  %v1769_v4 = vor.u32 1.1754944e-38, %v1768_v46  ;;  %v1646_v20 = vand.u32 2147483647, %v2573_v23  ;;  %vm1642_vm6 = vweird.f32 %v2573_v23  ;;  %v1456_v54 = vld [vmem:[#allocation4 + $0x30] sm:$0xff] }
 0x282   :  { %v1605_v2 = vsel %vm2565_vm5, %v1604_v7, %v1600_v47  ;;  %v1716_v8 = vadd.f32 %v1951_v0, %v1715_v29  ;;  %v1610_v38 = vmul.f32 %v1953_v52, %v1609_v59  ;;  %vm1767_vm5 = vcmp.eq.f32.partialorder %v1766_v18, 8.507059e+37 }
 0x283   :  { %v1955_v9 = vpop.eup %1954  ;;  %v1606_v30 = vmul.f32 %v1605_v2, %v1452_v63  ;;  %v2591_v10 = vpop.permute.xlu0 %1514  ;;  %v1649_v43 = vor.u32 1.1754944e-38, %v1648_v57  ;;  %vm1647_vm8 = vcmp.eq.f32.partialorder %v1646_v20, 8.507059e+37 }
 0x284   :  { %v1720_v17 = vsel %vm1719_vm11, %v1951_v0, %v1716_v8  ;;  %v1611_v12 = vadd.f32 %v1953_v52, %v1610_v38  ;;  %v1758_v15 = vmul.f32 %v1955_v9, %v2570_v58  ;;  %1958 = vrcp.f32 %v2591_v10  ;;  %v1957_v5 = vpop.eup %1956 }
 0x285   :  { %1804 = vst.msk [vmem:[%s2657_s3 + $0x10] sm:$0xff] %vm51_vm0, %v1606_v30  ;;  %v1725_v62 = vsel %vm1722_vm13, %v1724_v11, %v1720_v17  ;;  %v1638_v27 = vmul.f32 %v1957_v5, %v2573_v23  ;;  %vm1763_vm1 = vweird.f32 %v1955_v9  ;;  %vm1643_vm4 = vweird.f32 %v1957_v5 }
 0x286   :  { %v1726_v24 = vmul.f32 %v1725_v62, %v1460_v16  ;;  %v1615_v25 = vsel %vm1614_vm14, %v1953_v52, %v1611_v12  ;;  %v1759_v49 = vsub.f32 1.0, %v1758_v15  ;;  %vm1764_vm3 = vmor %vm1762_vm2, %vm1763_vm1  ;;  %v1663_v50 = vand.u32 2147483648, %v2591_v10 }
 0x287   :  { %v1620_v26 = vsel %vm1617_vm15, %v1619_v19, %v1615_v25  ;;  %v1639_v1 = vsub.f32 1.0, %v1638_v27  ;;  %vm1644_vm7 = vmor %vm1642_vm6, %vm1643_vm4  ;;  %v1661_v3 = vand.u32 2147483647, %v2591_v10  ;;  %vm1657_vm10 = vweird.f32 %v2591_v10 }
 0x288   :  { %1812 = vst.msk [vmem:[%s2657_s3 + $0x50] sm:$0xff] %vm51_vm0, %v1726_v24  ;;  %v1621_v14 = vmul.f32 %v1620_v26, %v1453_v55  ;;  %v1760_v13 = vmul.f32 %v1955_v9, %v1759_v49  ;;  %v1664_v51 = vor.u32 1.1754944e-38, %v1663_v50 }
 0x289   :  { %v1640_v32 = vmul.f32 %v1957_v5, %v1639_v1  ;;  %vm1662_vm12 = vcmp.eq.f32.partialorder %v1661_v3, 8.507059e+37 }
 0x28a   :  { %1805 = vst.msk [vmem:[%s2657_s3 + $0x18] sm:$0xff] %vm51_vm0, %v1621_v14  ;;  %v1761_v28 = vadd.f32 %v1955_v9, %v1760_v13  ;;  %v1959_v48 = vpop.eup %1958 }
 0x28b   :  { %v1525_v34 = vpop.permute.xlu1 %1524  ;;  %v1653_v44 = vmul.f32 %v1959_v48, %v2591_v10  ;;  %v1641_v42 = vadd.f32 %v1957_v5, %v1640_v32  ;;  %vm1658_vm9 = vweird.f32 %v1959_v48  ;;  %v1458_v10 = vld [vmem:[#allocation4 + $0x40] sm:$0xff] }
 0x28c   :  { %v1765_v35 = vsel %vm1764_vm3, %v1955_v9, %v1761_v28  ;;  %1960 = vrcp.f32 %v1525_v34  ;;  %vm1659_vm11 = vmor %vm1657_vm10, %vm1658_vm9  ;;  %v1693_v59 = vand.u32 2147483648, %v1525_v34  ;;  %v1691_v39 = vand.u32 2147483647, %v1525_v34 }
 0x28d   :  { %v1770_v36 = vsel %vm1767_vm5, %v1769_v4, %v1765_v35  ;;  %v1530_v22 = vpop.permute.xlu0 %1529  ;;  %v1654_v45 = vsub.f32 1.0, %v1653_v44  ;;  %v1645_v60 = vsel %vm1644_vm7, %v1957_v5, %v1641_v42  ;;  %vm1687_vm14 = vweird.f32 %v1525_v34  ;;  %v1459_v5 = vld [vmem:[#allocation4 + $0x48] sm:$0xff] }
 0x28e   :  { %v1771_v0 = vmul.f32 %v1770_v36, %v1463_v33  ;;  %1962 = vrcp.f32 %v1530_v22  ;;  %v1650_v58 = vsel %vm1647_vm8, %v1649_v43, %v1645_v60  ;;  %v1708_v63 = vand.u32 2147483648, %v1530_v22  ;;  %v1461_v33 = vld [vmem:[#allocation4 + $0x58] sm:$0xff] }
 0x28f   :  { %v1655_v52 = vmul.f32 %v1959_v48, %v1654_v45  ;;  %v1651_v37 = vmul.f32 %v1650_v58, %v1455_v21  ;;  %v1706_v38 = vand.u32 2147483647, %v1530_v22  ;;  %v1694_v9 = vor.u32 1.1754944e-38, %v1693_v59 }
 0x290   :  { %1815 = vst.msk [vmem:[%s2657_s3 + $0x68] sm:$0xff] %vm51_vm0, %v1771_v0  ;;  %vm1692_vm2 = vcmp.eq.f32.partialorder %v1691_v39, 8.507059e+37  ;;  %vm1702_vm3 = vweird.f32 %v1530_v22  ;;  %v1709_v12 = vor.u32 1.1754944e-38, %v1708_v63  ;;  %v1462_v0 = vld [vmem:[#allocation4 + $0x60] sm:$0xff]  ;;  %v1464_v63 = vld [vmem:[#allocation4 + $0x70] sm:$0xff] }
 0x291   :  { %v1656_v41 = vadd.f32 %v1959_v48, %v1655_v52  ;;  %1807 = vst.msk [vmem:[%s2657_s3 + $0x28] sm:$0xff] %vm51_vm0, %v1651_v37  ;;  %vm1707_vm5 = vcmp.eq.f32.partialorder %v1706_v38, 8.507059e+37 }
 0x292   :  { %v1961_v23 = vpop.eup %1960 }
 0x293   :  { %v1683_v7 = vmul.f32 %v1961_v23, %v1525_v34  ;;  %v1660_v61 = vsel %vm1659_vm11, %v1959_v48, %v1656_v41  ;;  %vm1688_vm13 = vweird.f32 %v1961_v23 }
 0x294   :  { %v1963_v6 = vpop.eup %1962  ;;  %v1665_v40 = vsel %vm1662_vm12, %v1664_v51, %v1660_v61  ;;  %vm1689_vm1 = vmor %vm1687_vm14, %vm1688_vm13  ;;  %v1465_v61 = vld [vmem:[#allocation4 + $0x78] sm:$0xff] }
 0x295   :  { %v1684_v31 = vsub.f32 1.0, %v1683_v7  ;;  %v1698_v56 = vmul.f32 %v1963_v6, %v1530_v22  ;;  %v1666_v29 = vmul.f32 %v1665_v40, %v1456_v54  ;;  %vm1703_vm15 = vweird.f32 %v1963_v6 }
 0x296   :  { %vm1704_vm4 = vmor %vm1702_vm3, %vm1703_vm15 }
 0x297   :  { %v1685_v47 = vmul.f32 %v1961_v23, %v1684_v31  ;;  %v1699_v53 = vsub.f32 1.0, %v1698_v56  ;;  %1808 = vst.msk [vmem:[%s2657_s3 + $0x30] sm:$0xff] %vm51_vm0, %v1666_v29 }
 0x299   :  { %v1686_v2 = vadd.f32 %v1961_v23, %v1685_v47  ;;  %v1700_v8 = vmul.f32 %v1963_v6, %v1699_v53 }
 0x29b   :  { %v1690_v30 = vsel %vm1689_vm1, %v1961_v23, %v1686_v2  ;;  %v1701_v11 = vadd.f32 %v1963_v6, %v1700_v8 }
 0x29c   :  { %v1695_v17 = vsel %vm1692_vm2, %v1694_v9, %v1690_v30  ;;  %v1540_v15 = vpop.permute.xlu1 %1539 }
 0x29d   :  { %v1696_v16 = vmul.f32 %v1695_v17, %v1458_v10  ;;  %v1705_v62 = vsel %vm1704_vm4, %v1963_v6, %v1701_v11  ;;  %1964 = vrcp.f32 %v1540_v15  ;;  %v1545_v19 = vpop.permute.xlu0 %1544  ;;  %v1738_v14 = vand.u32 2147483648, %v1540_v15 }
 0x29e   :  { %v1710_v24 = vsel %vm1707_vm5, %v1709_v12, %v1705_v62  ;;  %1966 = vrcp.f32 %v1545_v19  ;;  %v1736_v1 = vand.u32 2147483647, %v1540_v15  ;;  %v1753_v28 = vand.u32 2147483648, %v1545_v19 }
 0x29f   :  { %1810 = vst.msk [vmem:[%s2657_s3 + $0x40] sm:$0xff] %vm51_vm0, %v1696_v16  ;;  %v1711_v25 = vmul.f32 %v1710_v24, %v1459_v5  ;;  %v1751_v48 = vand.u32 2147483647, %v1545_v19  ;;  %vm1732_vm8 = vweird.f32 %v1540_v15  ;;  %v1739_v32 = vor.u32 1.1754944e-38, %v1738_v14 }
 0x2a0   :  { %vm1747_vm10 = vweird.f32 %v1545_v19  ;;  %vm1737_vm11 = vcmp.eq.f32.partialorder %v1736_v1, 8.507059e+37  ;;  %v1754_v35 = vor.u32 1.1754944e-38, %v1753_v28 }
 0x2a1   :  { %1811 = vst.msk [vmem:[%s2657_s3 + $0x48] sm:$0xff] %vm51_vm0, %v1711_v25  ;;  %vm1752_vm13 = vcmp.eq.f32.partialorder %v1751_v48, 8.507059e+37 }
 0x2a3   :  { %v1965_v49 = vpop.eup %1964 }
 0x2a4   :  { %v1967_v55 = vpop.eup %1966  ;;  %v1728_v26 = vmul.f32 %v1965_v49, %v1540_v15  ;;  %vm1733_vm6 = vweird.f32 %v1965_v49 }
 0x2a5   :  { %v1743_v46 = vmul.f32 %v1967_v55, %v1545_v19  ;;  %vm1748_vm7 = vweird.f32 %v1967_v55  ;;  %vm1734_vm9 = vmor %vm1732_vm8, %vm1733_vm6 }
 0x2a6   :  { %v1729_v27 = vsub.f32 1.0, %v1728_v26  ;;  %vm1749_vm12 = vmor %vm1747_vm10, %vm1748_vm7 }
 0x2a7   :  { %v1744_v13 = vsub.f32 1.0, %v1743_v46 }
 0x2a8   :  { %v1730_v18 = vmul.f32 %v1965_v49, %v1729_v27 }
 0x2a9   :  { %v1745_v57 = vmul.f32 %v1967_v55, %v1744_v13 }
 0x2aa   :  { %v1731_v4 = vadd.f32 %v1965_v49, %v1730_v18 }
 0x2ab   :  { %v1746_v20 = vadd.f32 %v1967_v55, %v1745_v57 }
 0x2ac   :  { %v1735_v34 = vsel %vm1734_vm9, %v1965_v49, %v1731_v4  ;;  %v1560_v44 = vpop.permute.xlu0 %1559 }
 0x2ad   :  { %v1740_v36 = vsel %vm1737_vm11, %v1739_v32, %v1735_v34  ;;  %v1750_v42 = vsel %vm1749_vm12, %v1967_v55, %v1746_v20  ;;  %1968 = vrcp.f32 %v1560_v44  ;;  %v1798_v52 = vand.u32 2147483648, %v1560_v44 }
 0x2ae   :  { %v1741_v22 = vmul.f32 %v1740_v36, %v1461_v33  ;;  %v1755_v43 = vsel %vm1752_vm13, %v1754_v35, %v1750_v42  ;;  %v1796_v37 = vand.u32 2147483647, %v1560_v44  ;;  %vm1792_vm15 = vweird.f32 %v1560_v44 }
 0x2af   :  { %v1756_v45 = vmul.f32 %v1755_v43, %v1462_v0  ;;  %v1799_v51 = vor.u32 1.1754944e-38, %v1798_v52 }
 0x2b0   :  { %1813 = vst.msk [vmem:[%s2657_s3 + $0x58] sm:$0xff] %vm51_vm0, %v1741_v22  ;;  %vm1797_vm2 = vcmp.eq.f32.partialorder %v1796_v37, 8.507059e+37 }
 0x2b1   :  { %1814 = vst.msk [vmem:[%s2657_s3 + $0x60] sm:$0xff] %vm51_vm0, %v1756_v45 }
 0x2b3   :  { %v1969_v60 = vpop.eup %1968  ;;  %v1555_v50 = vpop.permute.xlu1 %1554 }
 0x2b4   :  { %v1788_v21 = vmul.f32 %v1969_v60, %v1560_v44  ;;  %1970 = vrcp.f32 %v1555_v50  ;;  %vm1793_vm14 = vweird.f32 %v1969_v60  ;;  %v1783_v56 = vand.u32 2147483648, %v1555_v50 }
 0x2b5   :  { %vm1794_vm1 = vmor %vm1792_vm15, %vm1793_vm14  ;;  %v1781_v59 = vand.u32 2147483647, %v1555_v50  ;;  %vm1777_vm4 = vweird.f32 %v1555_v50 }
 0x2b6   :  { %v1789_v58 = vsub.f32 1.0, %v1788_v21  ;;  %v1784_v39 = vor.u32 1.1754944e-38, %v1783_v56 }
 0x2b7   :  { %vm1782_vm6 = vcmp.eq.f32.partialorder %v1781_v59, 8.507059e+37 }
 0x2b8   :  { %v1790_v3 = vmul.f32 %v1969_v60, %v1789_v58 }
 0x2ba   :  { %v1971_v23 = vpop.eup %1970  ;;  %v1791_v41 = vadd.f32 %v1969_v60, %v1790_v3 }
 0x2bb   :  { %v1773_v7 = vmul.f32 %v1971_v23, %v1555_v50  ;;  %vm1778_vm3 = vweird.f32 %v1971_v23 }
 0x2bc   :  { %v1795_v6 = vsel %vm1794_vm1, %v1969_v60, %v1791_v41  ;;  %vm1779_vm5 = vmor %vm1777_vm4, %vm1778_vm3 }
 0x2bd   :  { %v1800_v54 = vsel %vm1797_vm2, %v1799_v51, %v1795_v6  ;;  %v1774_v40 = vsub.f32 1.0, %v1773_v7 }
 0x2be   :  { %v1801_v31 = vmul.f32 %v1800_v54, %v1465_v61 }
 0x2bf   :  { %v1775_v29 = vmul.f32 %v1971_v23, %v1774_v40 }
 0x2c0   :  { %1817 = vst.msk [vmem:[%s2657_s3 + $0x78] sm:$0xff] %vm51_vm0, %v1801_v31 }
 0x2c1   :  { %v1776_v47 = vadd.f32 %v1971_v23, %v1775_v29 }
 0x2c3   :  { %v1780_v53 = vsel %vm1779_vm5, %v1971_v23, %v1776_v47 }
 0x2c4   :  { %v1785_v2 = vsel %vm1782_vm6, %v1784_v39, %v1780_v53 }
 0x2c5   :  { %v1786_v8 = vmul.f32 %v1785_v2, %v1464_v63 }
 0x2c7   :  { %1816 = vst.msk [vmem:[%s2657_s3 + $0x70] sm:$0xff] %vm51_vm0, %v1786_v8 }

</bundles_post_ra>
